<compile_context>
chip_gen: v7x
topology: tpu7x:2x2x1
jax: 0.10.0
libtpu: 0.0.40
codegen_flags: <defaults>
</compile_context>

<pallas_src>
import math

import jax
import jax.numpy as jnp
from jax import lax
from jax.experimental import pallas as pl
from jax.experimental.pallas import tpu as pltpu

_BN_EPS = 1e-5  # PyTorch BatchNorm2d default


def _activation(name, x):
    if name == "relu":
        return jnp.maximum(x, 0.0)
    if name == "leaky_relu":
        return jnp.where(x >= 0.0, x, 0.01 * x)
    if name == "selu":
        alpha = 1.6732632423543772
        scale = 1.0507009873554805
        return scale * jnp.where(x >= 0.0, x, alpha * (jnp.exp(x) - 1.0))
    if name == "siren":
        # TODO(synk): `Siren` class is undefined in the reference source; assuming sin(x).
        return jnp.sin(x)
    if name == "none":
        return x
    raise ValueError(f"unknown activation {name}")


def _fold_bn(bn):
    scale = bn["gamma"] / jnp.sqrt(bn["var"] + _BN_EPS)
    bias = bn["beta"] - bn["mean"] * scale
    return (scale.reshape(1, -1).astype(jnp.float32),
            bias.reshape(1, -1).astype(jnp.float32))


# ------------------------------ fused kernel --------------------------------

def _make_layer_kernel(H, W, cin, cout, d, n_blocks, has_shortcut, activation):
    """Kernel for a full ResNetLayer (one image per grid step)."""
    Hout = (H - 1) // d + 1
    Wout = (W - 1) // d + 1

    def conv3x3(src_ref, C, stride, w_ref):
        """3x3 conv (padding already inside src_ref) as 9 shifted bf16 MXU matmuls."""
        acc = None
        for kh in range(3):
            for kw in range(3):
                sh = pl.ds(kh, Hout, stride) if stride > 1 else pl.ds(kh, Hout)
                sw = pl.ds(kw, Wout, stride) if stride > 1 else pl.ds(kw, Wout)
                # (Hout, Wout, C) -> (Hout*Wout, C): leading-dim merge (free,
                # Wout is a multiple of 8 at these shapes).
                patch = src_ref[sh, sw, :].reshape(Hout * Wout, C)
                term = jnp.dot(patch.astype(jnp.bfloat16), w_ref[kh * 3 + kw],
                               preferred_element_type=jnp.float32)
                acc = term if acc is None else acc + term
        return acc

    def kernel(*refs):
        x_ref = refs[0]                         # (H+2, W+2, cin), pre-padded
        idx = 1
        nb0 = 9 if has_shortcut else 6
        b0 = refs[idx:idx + nb0]
        idx += nb0
        rest = []
        for _ in range(n_blocks - 1):
            rest.append(refs[idx:idx + 6])
            idx += 6
        out_ref = refs[idx]                     # (Hout, Wout, cout)
        hp_ref = refs[idx + 1]                  # (Hout+2, Wout+2, cout) scratch

        # Zero ONLY the 1-pixel border of the padded-hidden scratch; the interior
        # is always fully rewritten before it is read.  Done every grid step so
        # "parallel" batch semantics (per-core scratch on v7x) stay correct.
        zrow = jnp.zeros((1, Wout + 2, cout), jnp.float32)
        zcol = jnp.zeros((Hout + 2, 1, cout), jnp.float32)
        hp_ref[0:1, :, :] = zrow
        hp_ref[Hout + 1:Hout + 2, :, :] = zrow
        hp_ref[:, 0:1, :] = zcol
        hp_ref[:, Wout + 1:Wout + 2, :] = zcol

        # ---- block 0: cin -> cout, stride d, projected shortcut iff cin != cout
        w1_ref, s1_ref, b1_ref, w2_ref, s2_ref, b2_ref = b0[:6]
        h = conv3x3(x_ref, cin, d, w1_ref) * s1_ref[...] + b1_ref[...]
        h = _activation(activation, h)
        hp_ref[1:Hout + 1, 1:Wout + 1, :] = h.reshape(Hout, Wout, cout)
        y = conv3x3(hp_ref, cout, 1, w2_ref) * s2_ref[...] + b2_ref[...]

        if has_shortcut:
            ws_ref, ss_ref, bs_ref = b0[6:]
            sh = pl.ds(1, Hout, d) if d > 1 else pl.ds(1, Hout)
            sw = pl.ds(1, Wout, d) if d > 1 else pl.ds(1, Wout)
            xs = x_ref[sh, sw, :].reshape(Hout * Wout, cin)
            res = jnp.dot(xs.astype(jnp.bfloat16), ws_ref[...],
                          preferred_element_type=jnp.float32)
            res = res * ss_ref[...] + bs_ref[...]
        else:  # identity shortcut (stride 1, cin == cout)
            res = x_ref[1:H + 1, 1:W + 1, :].reshape(Hout * Wout, cout)
        cur = y + res                           # no post-add activation (matches module)

        # ---- blocks 1..n-1: cout -> cout, stride 1, identity shortcut
        for br in rest:
            w1_ref, s1_ref, b1_ref, w2_ref, s2_ref, b2_ref = br
            hp_ref[1:Hout + 1, 1:Wout + 1, :] = cur.reshape(Hout, Wout, cout)
            h = conv3x3(hp_ref, cout, 1, w1_ref) * s1_ref[...] + b1_ref[...]
            h = _activation(activation, h)
            hp_ref[1:Hout + 1, 1:Wout + 1, :] = h.reshape(Hout, Wout, cout)
            cur = conv3x3(hp_ref, cout, 1, w2_ref) * s2_ref[...] + b2_ref[...] + cur

        out_ref[...] = cur.reshape(Hout, Wout, cout).astype(out_ref.dtype)

    return kernel


def resnet_layer_nhwc(x, blocks, activation):
    """x: (N, H, W, Cin) float32 NHWC -> (N, Hout, Wout, Cout). One pallas_call."""
    N, H, W, cin = x.shape
    p0 = blocks[0]
    cout = p0["w1"].shape[-1]
    d = p0["downsampling"]
    has_shortcut = cin != cout
    assert has_shortcut or d == 1, "identity shortcut requires stride 1"
    Hout = (H - 1) // d + 1
    Wout = (W - 1) // d + 1

    # Pre-pad the input once in XLA so the kernel never zeroes / copies x.
    xpad = jnp.pad(x.astype(jnp.float32), ((0, 0), (1, 1), (1, 1), (0, 0)))

    inputs = [xpad]
    in_specs = [pl.BlockSpec((pl.Squeezed(), H + 2, W + 2, cin),
                             lambda n: (n, 0, 0, 0))]
    vec_spec = pl.BlockSpec((1, cout), lambda n: (0, 0))

    def add_conv_bn(w, bn, cin_b):
        s, b = _fold_bn(bn)
        inputs.extend([w.reshape(9, cin_b, cout).astype(jnp.bfloat16), s, b])
        in_specs.extend([pl.BlockSpec((9, cin_b, cout), lambda n: (0, 0, 0)),
                         vec_spec, vec_spec])

    # block 0
    add_conv_bn(p0["w1"], p0["bn1"], cin)
    add_conv_bn(p0["w2"], p0["bn2"], cout)
    if has_shortcut:
        ss, bs = _fold_bn(p0["bns"])
        inputs.extend([p0["ws"].astype(jnp.bfloat16), ss, bs])
        in_specs.extend([pl.BlockSpec((cin, cout), lambda n: (0, 0)),
                         vec_spec, vec_spec])
    # blocks 1..n-1
    for p in blocks[1:]:
        add_conv_bn(p["w1"], p["bn1"], cout)
        add_conv_bn(p["w2"], p["bn2"], cout)

    kernel = _make_layer_kernel(H, W, cin, cout, d, len(blocks), has_shortcut,
                                activation)
    return pl.pallas_call(
        kernel,
        out_shape=jax.ShapeDtypeStruct((N, Hout, Wout, cout), jnp.float32),
        grid=(N,),
        in_specs=in_specs,
        out_specs=pl.BlockSpec((pl.Squeezed(), Hout, Wout, cout),
                               lambda n: (n, 0, 0, 0)),
        scratch_shapes=[
            pltpu.VMEM((Hout + 2, Wout + 2, cout), jnp.float32),  # padded hidden
        ],
        compiler_params=pltpu.CompilerParams(
            dimension_semantics=("parallel",)),   # batch is independent (v7x 2 TCs)
    )(*inputs)


def resnet_layer_forward(x_nchw, layer_params, activation="relu"):
    x = jnp.transpose(x_nchw, (0, 2, 3, 1))      # NCHW -> NHWC
    y = resnet_layer_nhwc(x, layer_params, activation)
    return jnp.transpose(y, (0, 3, 1, 2))        # NHWC -> NCHW


# ------------------------- parameter construction --------------------------

def _init_bn(key, c):
    k1, k2, k3, k4 = jax.random.split(key, 4)
    return {
        "gamma": jax.random.uniform(k1, (c,), jnp.float32, 0.5, 1.5),
        "beta": 0.1 * jax.random.normal(k2, (c,), jnp.float32),
        "mean": 0.1 * jax.random.normal(k3, (c,), jnp.float32),
        "var": jax.random.uniform(k4, (c,), jnp.float32, 0.5, 1.5),
    }


def _init_block(key, cin, cout, d):
    ks = jax.random.split(key, 6)
    p = {
        "downsampling": d,
        "w1": jax.random.normal(ks[0], (3, 3, cin, cout), jnp.float32) / math.sqrt(9 * cin),
        "bn1": _init_bn(ks[1], cout),
        "w2": jax.random.normal(ks[2], (3, 3, cout, cout), jnp.float32) / math.sqrt(9 * cout),
        "bn2": _init_bn(ks[3], cout),
    }
    if cin != cout:
        p["ws"] = jax.random.normal(ks[4], (cin, cout), jnp.float32) / math.sqrt(cin)
        p["bns"] = _init_bn(ks[5], cout)
    return p


def init_resnet_layer(key, cin, cout, n=1):
    # ResNetLayer: downsampling=2 iff cin != cout; expansion=1 for BasicBlock.
    d = 2 if cin != cout else 1
    keys = jax.random.split(key, n)
    blocks = [_init_block(keys[0], cin, cout, d)]
    for i in range(1, n):
        blocks.append(_init_block(keys[i], cout, cout, 1))
    return blocks


# ------------------------------ reference ----------------------------------

def _ref_block(x, p, activation):  # x NHWC, plain-JAX (f32) reference
    d = p["downsampling"]

    def conv(inp, w, stride, pad):
        return lax.conv_general_dilated(
            inp, w, (stride, stride), ((pad, pad), (pad, pad)),
            dimension_numbers=("NHWC", "HWIO", "NHWC"))

    def bn(inp, b):
        s = b["gamma"] / jnp.sqrt(b["var"] + _BN_EPS)
        return inp * s + (b["beta"] - b["mean"] * s)

    h = _activation(activation, bn(conv(x, p["w1"], d, 1), p["bn1"]))
    y = bn(conv(h, p["w2"], 1, 1), p["bn2"])
    if "ws" in p:
        ws = p["ws"].reshape(1, 1, *p["ws"].shape)
        r = bn(conv(x, ws, d, 0), p["bns"])
    else:
        r = x
    return y + r


if __name__ == "__main__":
    key = jax.random.PRNGKey(0)
    kx, kp = jax.random.split(key)

    # ResNetLayer(in_channels=4, out_channels=8, activation='relu', n=2)
    x = jax.random.normal(kx, (2, 4, 16, 16), jnp.float32)   # NCHW, like PyTorch
    params = init_resnet_layer(kp, 4, 8, n=2)

    out = jax.block_until_ready(resnet_layer_forward(x, params, activation="relu"))
    assert out.shape == (2, 8, 8, 8), out.shape   # downsampling=2 halves H, W

    # sanity check against a pure-JAX f32 reference (loosened tol: bf16 MXU operands)
    xr = jnp.transpose(x, (0, 2, 3, 1))
    for p in params:
        xr = _ref_block(xr, p, "relu")
    ref = jnp.transpose(xr, (0, 3, 1, 2))
    err = float(jnp.max(jnp.abs(out - ref)))
    tol = 5e-2 * max(1.0, float(jnp.max(jnp.abs(ref))))
    assert err < tol, (err, tol)

    print("KERNEL_OK")
</pallas_src>

<mosaic_0001>
module attributes {stable_mosaic.version = 11 : i64} {
  func.func @kernel(%arg0: i32, %arg1: memref<1x18x18x4xf32, #tpu.memory_space<vmem>>, %arg2: memref<9x4x8xbf16, #tpu.memory_space<vmem>>, %arg3: memref<1x8xf32, #tpu.memory_space<vmem>>, %arg4: memref<1x8xf32, #tpu.memory_space<vmem>>, %arg5: memref<9x8x8xbf16, #tpu.memory_space<vmem>>, %arg6: memref<1x8xf32, #tpu.memory_space<vmem>>, %arg7: memref<1x8xf32, #tpu.memory_space<vmem>>, %arg8: memref<4x8xbf16, #tpu.memory_space<vmem>>, %arg9: memref<1x8xf32, #tpu.memory_space<vmem>>, %arg10: memref<1x8xf32, #tpu.memory_space<vmem>>, %arg11: memref<9x8x8xbf16, #tpu.memory_space<vmem>>, %arg12: memref<1x8xf32, #tpu.memory_space<vmem>>, %arg13: memref<1x8xf32, #tpu.memory_space<vmem>>, %arg14: memref<9x8x8xbf16, #tpu.memory_space<vmem>>, %arg15: memref<1x8xf32, #tpu.memory_space<vmem>>, %arg16: memref<1x8xf32, #tpu.memory_space<vmem>>, %arg17: memref<1x8x8x8xf32, #tpu.memory_space<vmem>>, %arg18: memref<10x10x8xf32, #tpu.memory_space<vmem>>) attributes {dimension_semantics = [#tpu.dimension_semantics<parallel>], iteration_bounds = array<i64: 2>, scalar_prefetch = 0 : i64, scratch_operands = 1 : i64, tpu.core_type = #tpu.core_type<tc>, window_params = [{transform_indices = @transform_0, window_bounds = array<i64: 1, 18, 18, 4>}, {pipeline_mode = #tpu.pipeline_mode<synchronous>, transform_indices = @transform_1, window_bounds = array<i64: 9, 4, 8>}, {pipeline_mode = #tpu.pipeline_mode<synchronous>, transform_indices = @transform_2, window_bounds = array<i64: 1, 8>}, {pipeline_mode = #tpu.pipeline_mode<synchronous>, transform_indices = @transform_3, window_bounds = array<i64: 1, 8>}, {pipeline_mode = #tpu.pipeline_mode<synchronous>, transform_indices = @transform_4, window_bounds = array<i64: 9, 8, 8>}, {pipeline_mode = #tpu.pipeline_mode<synchronous>, transform_indices = @transform_5, window_bounds = array<i64: 1, 8>}, {pipeline_mode = #tpu.pipeline_mode<synchronous>, transform_indices = @transform_6, window_bounds = array<i64: 1, 8>}, {pipeline_mode = #tpu.pipeline_mode<synchronous>, transform_indices = @transform_7, window_bounds = array<i64: 4, 8>}, {pipeline_mode = #tpu.pipeline_mode<synchronous>, transform_indices = @transform_8, window_bounds = array<i64: 1, 8>}, {pipeline_mode = #tpu.pipeline_mode<synchronous>, transform_indices = @transform_9, window_bounds = array<i64: 1, 8>}, {pipeline_mode = #tpu.pipeline_mode<synchronous>, transform_indices = @transform_10, window_bounds = array<i64: 9, 8, 8>}, {pipeline_mode = #tpu.pipeline_mode<synchronous>, transform_indices = @transform_11, window_bounds = array<i64: 1, 8>}, {pipeline_mode = #tpu.pipeline_mode<synchronous>, transform_indices = @transform_12, window_bounds = array<i64: 1, 8>}, {pipeline_mode = #tpu.pipeline_mode<synchronous>, transform_indices = @transform_13, window_bounds = array<i64: 9, 8, 8>}, {pipeline_mode = #tpu.pipeline_mode<synchronous>, transform_indices = @transform_14, window_bounds = array<i64: 1, 8>}, {pipeline_mode = #tpu.pipeline_mode<synchronous>, transform_indices = @transform_15, window_bounds = array<i64: 1, 8>}, {transform_indices = @transform_16, window_bounds = array<i64: 1, 8, 8, 8>}]} {
    %cst = arith.constant 0.000000e+00 : f32
    %0 = vector.broadcast %cst : f32 to vector<1x10x8xf32>
    %cst_0 = arith.constant 0.000000e+00 : f32
    %1 = vector.broadcast %cst_0 : f32 to vector<10x1x8xf32>
    %c0 = arith.constant 0 : index
    %c0_1 = arith.constant 0 : index
    %c0_2 = arith.constant 0 : index
    %2 = vector.load %arg18[%c0, %c0_1, %c0_2] : memref<10x10x8xf32, #tpu.memory_space<vmem>>, vector<1x10x8xf32>
    tpu.vector_store %arg18[%c0, %c0_1, %c0_2], %0 {strides = array<i32>} : memref<10x10x8xf32, #tpu.memory_space<vmem>>, vector<1x10x8xf32>,
    %c9 = arith.constant 9 : index
    %c0_3 = arith.constant 0 : index
    %c0_4 = arith.constant 0 : index
    %3 = vector.load %arg18[%c9, %c0_3, %c0_4] : memref<10x10x8xf32, #tpu.memory_space<vmem>>, vector<1x10x8xf32>
    tpu.vector_store %arg18[%c9, %c0_3, %c0_4], %0 {strides = array<i32>} : memref<10x10x8xf32, #tpu.memory_space<vmem>>, vector<1x10x8xf32>,
    %c0_5 = arith.constant 0 : index
    %c0_6 = arith.constant 0 : index
    %c0_7 = arith.constant 0 : index
    %4 = vector.load %arg18[%c0_5, %c0_6, %c0_7] : memref<10x10x8xf32, #tpu.memory_space<vmem>>, vector<10x1x8xf32>
    tpu.vector_store %arg18[%c0_5, %c0_6, %c0_7], %1 {strides = array<i32>} : memref<10x10x8xf32, #tpu.memory_space<vmem>>, vector<10x1x8xf32>,
    %c0_8 = arith.constant 0 : index
    %c9_9 = arith.constant 9 : index
    %c0_10 = arith.constant 0 : index
    %5 = vector.load %arg18[%c0_8, %c9_9, %c0_10] : memref<10x10x8xf32, #tpu.memory_space<vmem>>, vector<10x1x8xf32>
    tpu.vector_store %arg18[%c0_8, %c9_9, %c0_10], %1 {strides = array<i32>} : memref<10x10x8xf32, #tpu.memory_space<vmem>>, vector<10x1x8xf32>,
    %c0_11 = arith.constant 0 : index
    %c0_12 = arith.constant 0 : index
    %c0_13 = arith.constant 0 : index
    %c0_14 = arith.constant 0 : index
    %6 = tpu.strided_load %arg1[%c0_11, %c0_12, %c0_13, %c0_14] {strides = array<i32: 1, 2, 2, 1>} : memref<1x18x18x4xf32, #tpu.memory_space<vmem>>, vector<1x8x8x4xf32>
    %7 = vector.shape_cast %6 : vector<1x8x8x4xf32> to vector<8x8x4xf32>
    %8 = vector.shape_cast %7 : vector<8x8x4xf32> to vector<64x4xf32>
    %9 = arith.truncf %8 : vector<64x4xf32> to vector<64x4xbf16>
    %c0_15 = arith.constant 0 : index
    %c0_16 = arith.constant 0 : index
    %c0_17 = arith.constant 0 : index
    %10 = vector.load %arg2[%c0_15, %c0_16, %c0_17] : memref<9x4x8xbf16, #tpu.memory_space<vmem>>, vector<1x4x8xbf16>
    %11 = vector.shape_cast %10 : vector<1x4x8xbf16> to vector<4x8xbf16>
    %cst_18 = arith.constant dense<0.000000e+00> : vector<64x8xf32>
    %12 = tpu.matmul %9, %11, %cst_18 {dimension_numbers = #tpu.dot_dimension_numbers<[1], [0], [0], [1], [0, 0, 1, 1], [], []>} : vector<64x4xbf16>, vector<4x8xbf16>, vector<64x8xf32> -> vector<64x8xf32>
    %c0_19 = arith.constant 0 : index
    %c0_20 = arith.constant 0 : index
    %c1 = arith.constant 1 : index
    %c0_21 = arith.constant 0 : index
    %13 = tpu.strided_load %arg1[%c0_19, %c0_20, %c1, %c0_21] {strides = array<i32: 1, 2, 2, 1>} : memref<1x18x18x4xf32, #tpu.memory_space<vmem>>, vector<1x8x8x4xf32>
    %14 = vector.shape_cast %13 : vector<1x8x8x4xf32> to vector<8x8x4xf32>
    %15 = vector.shape_cast %14 : vector<8x8x4xf32> to vector<64x4xf32>
    %16 = arith.truncf %15 : vector<64x4xf32> to vector<64x4xbf16>
    %c1_22 = arith.constant 1 : index
    %c0_23 = arith.constant 0 : index
    %c0_24 = arith.constant 0 : index
    %17 = vector.load %arg2[%c1_22, %c0_23, %c0_24] : memref<9x4x8xbf16, #tpu.memory_space<vmem>>, vector<1x4x8xbf16>
    %18 = vector.shape_cast %17 : vector<1x4x8xbf16> to vector<4x8xbf16>
    %cst_25 = arith.constant dense<0.000000e+00> : vector<64x8xf32>
    %19 = tpu.matmul %16, %18, %cst_25 {dimension_numbers = #tpu.dot_dimension_numbers<[1], [0], [0], [1], [0, 0, 1, 1], [], []>} : vector<64x4xbf16>, vector<4x8xbf16>, vector<64x8xf32> -> vector<64x8xf32>
    %20 = arith.addf %12, %19 : vector<64x8xf32>
    %c0_26 = arith.constant 0 : index
    %c0_27 = arith.constant 0 : index
    %c2 = arith.constant 2 : index
    %c0_28 = arith.constant 0 : index
    %21 = tpu.strided_load %arg1[%c0_26, %c0_27, %c2, %c0_28] {strides = array<i32: 1, 2, 2, 1>} : memref<1x18x18x4xf32, #tpu.memory_space<vmem>>, vector<1x8x8x4xf32>
    %22 = vector.shape_cast %21 : vector<1x8x8x4xf32> to vector<8x8x4xf32>
    %23 = vector.shape_cast %22 : vector<8x8x4xf32> to vector<64x4xf32>
    %24 = arith.truncf %23 : vector<64x4xf32> to vector<64x4xbf16>
    %c2_29 = arith.constant 2 : index
    %c0_30 = arith.constant 0 : index
    %c0_31 = arith.constant 0 : index
    %25 = vector.load %arg2[%c2_29, %c0_30, %c0_31] : memref<9x4x8xbf16, #tpu.memory_space<vmem>>, vector<1x4x8xbf16>
    %26 = vector.shape_cast %25 : vector<1x4x8xbf16> to vector<4x8xbf16>
    %cst_32 = arith.constant dense<0.000000e+00> : vector<64x8xf32>
    %27 = tpu.matmul %24, %26, %cst_32 {dimension_numbers = #tpu.dot_dimension_numbers<[1], [0], [0], [1], [0, 0, 1, 1], [], []>} : vector<64x4xbf16>, vector<4x8xbf16>, vector<64x8xf32> -> vector<64x8xf32>
    %28 = arith.addf %20, %27 : vector<64x8xf32>
    %c0_33 = arith.constant 0 : index
    %c1_34 = arith.constant 1 : index
    %c0_35 = arith.constant 0 : index
    %c0_36 = arith.constant 0 : index
    %29 = tpu.strided_load %arg1[%c0_33, %c1_34, %c0_35, %c0_36] {strides = array<i32: 1, 2, 2, 1>} : memref<1x18x18x4xf32, #tpu.memory_space<vmem>>, vector<1x8x8x4xf32>
    %30 = vector.shape_cast %29 : vector<1x8x8x4xf32> to vector<8x8x4xf32>
    %31 = vector.shape_cast %30 : vector<8x8x4xf32> to vector<64x4xf32>
    %32 = arith.truncf %31 : vector<64x4xf32> to vector<64x4xbf16>
    %c3 = arith.constant 3 : index
    %c0_37 = arith.constant 0 : index
    %c0_38 = arith.constant 0 : index
    %33 = vector.load %arg2[%c3, %c0_37, %c0_38] : memref<9x4x8xbf16, #tpu.memory_space<vmem>>, vector<1x4x8xbf16>
    %34 = vector.shape_cast %33 : vector<1x4x8xbf16> to vector<4x8xbf16>
    %cst_39 = arith.constant dense<0.000000e+00> : vector<64x8xf32>
    %35 = tpu.matmul %32, %34, %cst_39 {dimension_numbers = #tpu.dot_dimension_numbers<[1], [0], [0], [1], [0, 0, 1, 1], [], []>} : vector<64x4xbf16>, vector<4x8xbf16>, vector<64x8xf32> -> vector<64x8xf32>
    %36 = arith.addf %28, %35 : vector<64x8xf32>
    %c0_40 = arith.constant 0 : index
    %c1_41 = arith.constant 1 : index
    %c1_42 = arith.constant 1 : index
    %c0_43 = arith.constant 0 : index
    %37 = tpu.strided_load %arg1[%c0_40, %c1_41, %c1_42, %c0_43] {strides = array<i32: 1, 2, 2, 1>} : memref<1x18x18x4xf32, #tpu.memory_space<vmem>>, vector<1x8x8x4xf32>
    %38 = vector.shape_cast %37 : vector<1x8x8x4xf32> to vector<8x8x4xf32>
    %39 = vector.shape_cast %38 : vector<8x8x4xf32> to vector<64x4xf32>
    %40 = arith.truncf %39 : vector<64x4xf32> to vector<64x4xbf16>
    %c4 = arith.constant 4 : index
    %c0_44 = arith.constant 0 : index
    %c0_45 = arith.constant 0 : index
    %41 = vector.load %arg2[%c4, %c0_44, %c0_45] : memref<9x4x8xbf16, #tpu.memory_space<vmem>>, vector<1x4x8xbf16>
    %42 = vector.shape_cast %41 : vector<1x4x8xbf16> to vector<4x8xbf16>
    %cst_46 = arith.constant dense<0.000000e+00> : vector<64x8xf32>
    %43 = tpu.matmul %40, %42, %cst_46 {dimension_numbers = #tpu.dot_dimension_numbers<[1], [0], [0], [1], [0, 0, 1, 1], [], []>} : vector<64x4xbf16>, vector<4x8xbf16>, vector<64x8xf32> -> vector<64x8xf32>
    %44 = arith.addf %36, %43 : vector<64x8xf32>
    %c0_47 = arith.constant 0 : index
    %c1_48 = arith.constant 1 : index
    %c2_49 = arith.constant 2 : index
    %c0_50 = arith.constant 0 : index
    %45 = tpu.strided_load %arg1[%c0_47, %c1_48, %c2_49, %c0_50] {strides = array<i32: 1, 2, 2, 1>} : memref<1x18x18x4xf32, #tpu.memory_space<vmem>>, vector<1x8x8x4xf32>
    %46 = vector.shape_cast %45 : vector<1x8x8x4xf32> to vector<8x8x4xf32>
    %47 = vector.shape_cast %46 : vector<8x8x4xf32> to vector<64x4xf32>
    %48 = arith.truncf %47 : vector<64x4xf32> to vector<64x4xbf16>
    %c5 = arith.constant 5 : index
    %c0_51 = arith.constant 0 : index
    %c0_52 = arith.constant 0 : index
    %49 = vector.load %arg2[%c5, %c0_51, %c0_52] : memref<9x4x8xbf16, #tpu.memory_space<vmem>>, vector<1x4x8xbf16>
    %50 = vector.shape_cast %49 : vector<1x4x8xbf16> to vector<4x8xbf16>
    %cst_53 = arith.constant dense<0.000000e+00> : vector<64x8xf32>
    %51 = tpu.matmul %48, %50, %cst_53 {dimension_numbers = #tpu.dot_dimension_numbers<[1], [0], [0], [1], [0, 0, 1, 1], [], []>} : vector<64x4xbf16>, vector<4x8xbf16>, vector<64x8xf32> -> vector<64x8xf32>
    %52 = arith.addf %44, %51 : vector<64x8xf32>
    %c0_54 = arith.constant 0 : index
    %c2_55 = arith.constant 2 : index
    %c0_56 = arith.constant 0 : index
    %c0_57 = arith.constant 0 : index
    %53 = tpu.strided_load %arg1[%c0_54, %c2_55, %c0_56, %c0_57] {strides = array<i32: 1, 2, 2, 1>} : memref<1x18x18x4xf32, #tpu.memory_space<vmem>>, vector<1x8x8x4xf32>
    %54 = vector.shape_cast %53 : vector<1x8x8x4xf32> to vector<8x8x4xf32>
    %55 = vector.shape_cast %54 : vector<8x8x4xf32> to vector<64x4xf32>
    %56 = arith.truncf %55 : vector<64x4xf32> to vector<64x4xbf16>
    %c6 = arith.constant 6 : index
    %c0_58 = arith.constant 0 : index
    %c0_59 = arith.constant 0 : index
    %57 = vector.load %arg2[%c6, %c0_58, %c0_59] : memref<9x4x8xbf16, #tpu.memory_space<vmem>>, vector<1x4x8xbf16>
    %58 = vector.shape_cast %57 : vector<1x4x8xbf16> to vector<4x8xbf16>
    %cst_60 = arith.constant dense<0.000000e+00> : vector<64x8xf32>
    %59 = tpu.matmul %56, %58, %cst_60 {dimension_numbers = #tpu.dot_dimension_numbers<[1], [0], [0], [1], [0, 0, 1, 1], [], []>} : vector<64x4xbf16>, vector<4x8xbf16>, vector<64x8xf32> -> vector<64x8xf32>
    %60 = arith.addf %52, %59 : vector<64x8xf32>
    %c0_61 = arith.constant 0 : index
    %c2_62 = arith.constant 2 : index
    %c1_63 = arith.constant 1 : index
    %c0_64 = arith.constant 0 : index
    %61 = tpu.strided_load %arg1[%c0_61, %c2_62, %c1_63, %c0_64] {strides = array<i32: 1, 2, 2, 1>} : memref<1x18x18x4xf32, #tpu.memory_space<vmem>>, vector<1x8x8x4xf32>
    %62 = vector.shape_cast %61 : vector<1x8x8x4xf32> to vector<8x8x4xf32>
    %63 = vector.shape_cast %62 : vector<8x8x4xf32> to vector<64x4xf32>
    %64 = arith.truncf %63 : vector<64x4xf32> to vector<64x4xbf16>
    %c7 = arith.constant 7 : index
    %c0_65 = arith.constant 0 : index
    %c0_66 = arith.constant 0 : index
    %65 = vector.load %arg2[%c7, %c0_65, %c0_66] : memref<9x4x8xbf16, #tpu.memory_space<vmem>>, vector<1x4x8xbf16>
    %66 = vector.shape_cast %65 : vector<1x4x8xbf16> to vector<4x8xbf16>
    %cst_67 = arith.constant dense<0.000000e+00> : vector<64x8xf32>
    %67 = tpu.matmul %64, %66, %cst_67 {dimension_numbers = #tpu.dot_dimension_numbers<[1], [0], [0], [1], [0, 0, 1, 1], [], []>} : vector<64x4xbf16>, vector<4x8xbf16>, vector<64x8xf32> -> vector<64x8xf32>
    %68 = arith.addf %60, %67 : vector<64x8xf32>
    %c0_68 = arith.constant 0 : index
    %c2_69 = arith.constant 2 : index
    %c2_70 = arith.constant 2 : index
    %c0_71 = arith.constant 0 : index
    %69 = tpu.strided_load %arg1[%c0_68, %c2_69, %c2_70, %c0_71] {strides = array<i32: 1, 2, 2, 1>} : memref<1x18x18x4xf32, #tpu.memory_space<vmem>>, vector<1x8x8x4xf32>
    %70 = vector.shape_cast %69 : vector<1x8x8x4xf32> to vector<8x8x4xf32>
    %71 = vector.shape_cast %70 : vector<8x8x4xf32> to vector<64x4xf32>
    %72 = arith.truncf %71 : vector<64x4xf32> to vector<64x4xbf16>
    %c8 = arith.constant 8 : index
    %c0_72 = arith.constant 0 : index
    %c0_73 = arith.constant 0 : index
    %73 = vector.load %arg2[%c8, %c0_72, %c0_73] : memref<9x4x8xbf16, #tpu.memory_space<vmem>>, vector<1x4x8xbf16>
    %74 = vector.shape_cast %73 : vector<1x4x8xbf16> to vector<4x8xbf16>
    %cst_74 = arith.constant dense<0.000000e+00> : vector<64x8xf32>
    %75 = tpu.matmul %72, %74, %cst_74 {dimension_numbers = #tpu.dot_dimension_numbers<[1], [0], [0], [1], [0, 0, 1, 1], [], []>} : vector<64x4xbf16>, vector<4x8xbf16>, vector<64x8xf32> -> vector<64x8xf32>
    %76 = arith.addf %68, %75 : vector<64x8xf32>
    %c0_75 = arith.constant 0 : index
    %c0_76 = arith.constant 0 : index
    %77 = vector.load %arg3[%c0_75, %c0_76] : memref<1x8xf32, #tpu.memory_space<vmem>>, vector<1x8xf32>
    %78 = vector.broadcast %77 : vector<1x8xf32> to vector<64x8xf32>
    %79 = arith.mulf %76, %78 : vector<64x8xf32>
    %c0_77 = arith.constant 0 : index
    %c0_78 = arith.constant 0 : index
    %80 = vector.load %arg4[%c0_77, %c0_78] : memref<1x8xf32, #tpu.memory_space<vmem>>, vector<1x8xf32>
    %81 = vector.broadcast %80 : vector<1x8xf32> to vector<64x8xf32>
    %82 = arith.addf %79, %81 : vector<64x8xf32>
    %cst_79 = arith.constant 0.000000e+00 : f32
    %83 = vector.broadcast %cst_79 : f32 to vector<64x8xf32>
    %84 = arith.maximumf %82, %83 : vector<64x8xf32>
    %85 = vector.shape_cast %84 : vector<64x8xf32> to vector<8x8x8xf32>
    %c1_80 = arith.constant 1 : index
    %c1_81 = arith.constant 1 : index
    %c0_82 = arith.constant 0 : index
    %86 = vector.load %arg18[%c1_80, %c1_81, %c0_82] : memref<10x10x8xf32, #tpu.memory_space<vmem>>, vector<8x8x8xf32>
    tpu.vector_store %arg18[%c1_80, %c1_81, %c0_82], %85 {strides = array<i32>} : memref<10x10x8xf32, #tpu.memory_space<vmem>>, vector<8x8x8xf32>,
    %c0_83 = arith.constant 0 : index
    %c0_84 = arith.constant 0 : index
    %c0_85 = arith.constant 0 : index
    %87 = vector.load %arg18[%c0_83, %c0_84, %c0_85] : memref<10x10x8xf32, #tpu.memory_space<vmem>>, vector<8x8x8xf32>
    %88 = vector.shape_cast %87 : vector<8x8x8xf32> to vector<64x8xf32>
    %89 = arith.truncf %88 : vector<64x8xf32> to vector<64x8xbf16>
    %c0_86 = arith.constant 0 : index
    %c0_87 = arith.constant 0 : index
    %c0_88 = arith.constant 0 : index
    %90 = vector.load %arg5[%c0_86, %c0_87, %c0_88] : memref<9x8x8xbf16, #tpu.memory_space<vmem>>, vector<1x8x8xbf16>
    %91 = vector.shape_cast %90 : vector<1x8x8xbf16> to vector<8x8xbf16>
    %cst_89 = arith.constant dense<0.000000e+00> : vector<64x8xf32>
    %92 = tpu.matmul %89, %91, %cst_89 {dimension_numbers = #tpu.dot_dimension_numbers<[1], [0], [0], [1], [0, 0, 1, 1], [], []>} : vector<64x8xbf16>, vector<8x8xbf16>, vector<64x8xf32> -> vector<64x8xf32>
    %c0_90 = arith.constant 0 : index
    %c1_91 = arith.constant 1 : index
    %c0_92 = arith.constant 0 : index
    %93 = vector.load %arg18[%c0_90, %c1_91, %c0_92] : memref<10x10x8xf32, #tpu.memory_space<vmem>>, vector<8x8x8xf32>
    %94 = vector.shape_cast %93 : vector<8x8x8xf32> to vector<64x8xf32>
    %95 = arith.truncf %94 : vector<64x8xf32> to vector<64x8xbf16>
    %c1_93 = arith.constant 1 : index
    %c0_94 = arith.constant 0 : index
    %c0_95 = arith.constant 0 : index
    %96 = vector.load %arg5[%c1_93, %c0_94, %c0_95] : memref<9x8x8xbf16, #tpu.memory_space<vmem>>, vector<1x8x8xbf16>
    %97 = vector.shape_cast %96 : vector<1x8x8xbf16> to vector<8x8xbf16>
    %cst_96 = arith.constant dense<0.000000e+00> : vector<64x8xf32>
    %98 = tpu.matmul %95, %97, %cst_96 {dimension_numbers = #tpu.dot_dimension_numbers<[1], [0], [0], [1], [0, 0, 1, 1], [], []>} : vector<64x8xbf16>, vector<8x8xbf16>, vector<64x8xf32> -> vector<64x8xf32>
    %99 = arith.addf %92, %98 : vector<64x8xf32>
    %c0_97 = arith.constant 0 : index
    %c2_98 = arith.constant 2 : index
    %c0_99 = arith.constant 0 : index
    %100 = vector.load %arg18[%c0_97, %c2_98, %c0_99] : memref<10x10x8xf32, #tpu.memory_space<vmem>>, vector<8x8x8xf32>
    %101 = vector.shape_cast %100 : vector<8x8x8xf32> to vector<64x8xf32>
    %102 = arith.truncf %101 : vector<64x8xf32> to vector<64x8xbf16>
    %c2_100 = arith.constant 2 : index
    %c0_101 = arith.constant 0 : index
    %c0_102 = arith.constant 0 : index
    %103 = vector.load %arg5[%c2_100, %c0_101, %c0_102] : memref<9x8x8xbf16, #tpu.memory_space<vmem>>, vector<1x8x8xbf16>
    %104 = vector.shape_cast %103 : vector<1x8x8xbf16> to vector<8x8xbf16>
    %cst_103 = arith.constant dense<0.000000e+00> : vector<64x8xf32>
    %105 = tpu.matmul %102, %104, %cst_103 {dimension_numbers = #tpu.dot_dimension_numbers<[1], [0], [0], [1], [0, 0, 1, 1], [], []>} : vector<64x8xbf16>, vector<8x8xbf16>, vector<64x8xf32> -> vector<64x8xf32>
    %106 = arith.addf %99, %105 : vector<64x8xf32>
    %c1_104 = arith.constant 1 : index
    %c0_105 = arith.constant 0 : index
    %c0_106 = arith.constant 0 : index
    %107 = vector.load %arg18[%c1_104, %c0_105, %c0_106] : memref<10x10x8xf32, #tpu.memory_space<vmem>>, vector<8x8x8xf32>
    %108 = vector.shape_cast %107 : vector<8x8x8xf32> to vector<64x8xf32>
    %109 = arith.truncf %108 : vector<64x8xf32> to vector<64x8xbf16>
    %c3_107 = arith.constant 3 : index
    %c0_108 = arith.constant 0 : index
    %c0_109 = arith.constant 0 : index
    %110 = vector.load %arg5[%c3_107, %c0_108, %c0_109] : memref<9x8x8xbf16, #tpu.memory_space<vmem>>, vector<1x8x8xbf16>
    %111 = vector.shape_cast %110 : vector<1x8x8xbf16> to vector<8x8xbf16>
    %cst_110 = arith.constant dense<0.000000e+00> : vector<64x8xf32>
    %112 = tpu.matmul %109, %111, %cst_110 {dimension_numbers = #tpu.dot_dimension_numbers<[1], [0], [0], [1], [0, 0, 1, 1], [], []>} : vector<64x8xbf16>, vector<8x8xbf16>, vector<64x8xf32> -> vector<64x8xf32>
    %113 = arith.addf %106, %112 : vector<64x8xf32>
    %c1_111 = arith.constant 1 : index
    %c1_112 = arith.constant 1 : index
    %c0_113 = arith.constant 0 : index
    %114 = vector.load %arg18[%c1_111, %c1_112, %c0_113] : memref<10x10x8xf32, #tpu.memory_space<vmem>>, vector<8x8x8xf32>
    %115 = vector.shape_cast %114 : vector<8x8x8xf32> to vector<64x8xf32>
    %116 = arith.truncf %115 : vector<64x8xf32> to vector<64x8xbf16>
    %c4_114 = arith.constant 4 : index
    %c0_115 = arith.constant 0 : index
    %c0_116 = arith.constant 0 : index
    %117 = vector.load %arg5[%c4_114, %c0_115, %c0_116] : memref<9x8x8xbf16, #tpu.memory_space<vmem>>, vector<1x8x8xbf16>
    %118 = vector.shape_cast %117 : vector<1x8x8xbf16> to vector<8x8xbf16>
    %cst_117 = arith.constant dense<0.000000e+00> : vector<64x8xf32>
    %119 = tpu.matmul %116, %118, %cst_117 {dimension_numbers = #tpu.dot_dimension_numbers<[1], [0], [0], [1], [0, 0, 1, 1], [], []>} : vector<64x8xbf16>, vector<8x8xbf16>, vector<64x8xf32> -> vector<64x8xf32>
    %120 = arith.addf %113, %119 : vector<64x8xf32>
    %c1_118 = arith.constant 1 : index
    %c2_119 = arith.constant 2 : index
    %c0_120 = arith.constant 0 : index
    %121 = vector.load %arg18[%c1_118, %c2_119, %c0_120] : memref<10x10x8xf32, #tpu.memory_space<vmem>>, vector<8x8x8xf32>
    %122 = vector.shape_cast %121 : vector<8x8x8xf32> to vector<64x8xf32>
    %123 = arith.truncf %122 : vector<64x8xf32> to vector<64x8xbf16>
    %c5_121 = arith.constant 5 : index
    %c0_122 = arith.constant 0 : index
    %c0_123 = arith.constant 0 : index
    %124 = vector.load %arg5[%c5_121, %c0_122, %c0_123] : memref<9x8x8xbf16, #tpu.memory_space<vmem>>, vector<1x8x8xbf16>
    %125 = vector.shape_cast %124 : vector<1x8x8xbf16> to vector<8x8xbf16>
    %cst_124 = arith.constant dense<0.000000e+00> : vector<64x8xf32>
    %126 = tpu.matmul %123, %125, %cst_124 {dimension_numbers = #tpu.dot_dimension_numbers<[1], [0], [0], [1], [0, 0, 1, 1], [], []>} : vector<64x8xbf16>, vector<8x8xbf16>, vector<64x8xf32> -> vector<64x8xf32>
    %127 = arith.addf %120, %126 : vector<64x8xf32>
    %c2_125 = arith.constant 2 : index
    %c0_126 = arith.constant 0 : index
    %c0_127 = arith.constant 0 : index
    %128 = vector.load %arg18[%c2_125, %c0_126, %c0_127] : memref<10x10x8xf32, #tpu.memory_space<vmem>>, vector<8x8x8xf32>
    %129 = vector.shape_cast %128 : vector<8x8x8xf32> to vector<64x8xf32>
    %130 = arith.truncf %129 : vector<64x8xf32> to vector<64x8xbf16>
    %c6_128 = arith.constant 6 : index
    %c0_129 = arith.constant 0 : index
    %c0_130 = arith.constant 0 : index
    %131 = vector.load %arg5[%c6_128, %c0_129, %c0_130] : memref<9x8x8xbf16, #tpu.memory_space<vmem>>, vector<1x8x8xbf16>
    %132 = vector.shape_cast %131 : vector<1x8x8xbf16> to vector<8x8xbf16>
    %cst_131 = arith.constant dense<0.000000e+00> : vector<64x8xf32>
    %133 = tpu.matmul %130, %132, %cst_131 {dimension_numbers = #tpu.dot_dimension_numbers<[1], [0], [0], [1], [0, 0, 1, 1], [], []>} : vector<64x8xbf16>, vector<8x8xbf16>, vector<64x8xf32> -> vector<64x8xf32>
    %134 = arith.addf %127, %133 : vector<64x8xf32>
    %c2_132 = arith.constant 2 : index
    %c1_133 = arith.constant 1 : index
    %c0_134 = arith.constant 0 : index
    %135 = vector.load %arg18[%c2_132, %c1_133, %c0_134] : memref<10x10x8xf32, #tpu.memory_space<vmem>>, vector<8x8x8xf32>
    %136 = vector.shape_cast %135 : vector<8x8x8xf32> to vector<64x8xf32>
    %137 = arith.truncf %136 : vector<64x8xf32> to vector<64x8xbf16>
    %c7_135 = arith.constant 7 : index
    %c0_136 = arith.constant 0 : index
    %c0_137 = arith.constant 0 : index
    %138 = vector.load %arg5[%c7_135, %c0_136, %c0_137] : memref<9x8x8xbf16, #tpu.memory_space<vmem>>, vector<1x8x8xbf16>
    %139 = vector.shape_cast %138 : vector<1x8x8xbf16> to vector<8x8xbf16>
    %cst_138 = arith.constant dense<0.000000e+00> : vector<64x8xf32>
    %140 = tpu.matmul %137, %139, %cst_138 {dimension_numbers = #tpu.dot_dimension_numbers<[1], [0], [0], [1], [0, 0, 1, 1], [], []>} : vector<64x8xbf16>, vector<8x8xbf16>, vector<64x8xf32> -> vector<64x8xf32>
    %141 = arith.addf %134, %140 : vector<64x8xf32>
    %c2_139 = arith.constant 2 : index
    %c2_140 = arith.constant 2 : index
    %c0_141 = arith.constant 0 : index
    %142 = vector.load %arg18[%c2_139, %c2_140, %c0_141] : memref<10x10x8xf32, #tpu.memory_space<vmem>>, vector<8x8x8xf32>
    %143 = vector.shape_cast %142 : vector<8x8x8xf32> to vector<64x8xf32>
    %144 = arith.truncf %143 : vector<64x8xf32> to vector<64x8xbf16>
    %c8_142 = arith.constant 8 : index
    %c0_143 = arith.constant 0 : index
    %c0_144 = arith.constant 0 : index
    %145 = vector.load %arg5[%c8_142, %c0_143, %c0_144] : memref<9x8x8xbf16, #tpu.memory_space<vmem>>, vector<1x8x8xbf16>
    %146 = vector.shape_cast %145 : vector<1x8x8xbf16> to vector<8x8xbf16>
    %cst_145 = arith.constant dense<0.000000e+00> : vector<64x8xf32>
    %147 = tpu.matmul %144, %146, %cst_145 {dimension_numbers = #tpu.dot_dimension_numbers<[1], [0], [0], [1], [0, 0, 1, 1], [], []>} : vector<64x8xbf16>, vector<8x8xbf16>, vector<64x8xf32> -> vector<64x8xf32>
    %148 = arith.addf %141, %147 : vector<64x8xf32>
    %c0_146 = arith.constant 0 : index
    %c0_147 = arith.constant 0 : index
    %149 = vector.load %arg6[%c0_146, %c0_147] : memref<1x8xf32, #tpu.memory_space<vmem>>, vector<1x8xf32>
    %150 = vector.broadcast %149 : vector<1x8xf32> to vector<64x8xf32>
    %151 = arith.mulf %148, %150 : vector<64x8xf32>
    %c0_148 = arith.constant 0 : index
    %c0_149 = arith.constant 0 : index
    %152 = vector.load %arg7[%c0_148, %c0_149] : memref<1x8xf32, #tpu.memory_space<vmem>>, vector<1x8xf32>
    %153 = vector.broadcast %152 : vector<1x8xf32> to vector<64x8xf32>
    %154 = arith.addf %151, %153 : vector<64x8xf32>
    %c0_150 = arith.constant 0 : index
    %c1_151 = arith.constant 1 : index
    %c1_152 = arith.constant 1 : index
    %c0_153 = arith.constant 0 : index
    %155 = tpu.strided_load %arg1[%c0_150, %c1_151, %c1_152, %c0_153] {strides = array<i32: 1, 2, 2, 1>} : memref<1x18x18x4xf32, #tpu.memory_space<vmem>>, vector<1x8x8x4xf32>
    %156 = vector.shape_cast %155 : vector<1x8x8x4xf32> to vector<8x8x4xf32>
    %157 = vector.shape_cast %156 : vector<8x8x4xf32> to vector<64x4xf32>
    %158 = arith.truncf %157 : vector<64x4xf32> to vector<64x4xbf16>
    %c0_154 = arith.constant 0 : index
    %c0_155 = arith.constant 0 : index
    %159 = vector.load %arg8[%c0_154, %c0_155] : memref<4x8xbf16, #tpu.memory_space<vmem>>, vector<4x8xbf16>
    %cst_156 = arith.constant dense<0.000000e+00> : vector<64x8xf32>
    %160 = tpu.matmul %158, %159, %cst_156 {dimension_numbers = #tpu.dot_dimension_numbers<[1], [0], [0], [1], [0, 0, 1, 1], [], []>} : vector<64x4xbf16>, vector<4x8xbf16>, vector<64x8xf32> -> vector<64x8xf32>
    %c0_157 = arith.constant 0 : index
    %c0_158 = arith.constant 0 : index
    %161 = vector.load %arg9[%c0_157, %c0_158] : memref<1x8xf32, #tpu.memory_space<vmem>>, vector<1x8xf32>
    %162 = vector.broadcast %161 : vector<1x8xf32> to vector<64x8xf32>
    %163 = arith.mulf %160, %162 : vector<64x8xf32>
    %c0_159 = arith.constant 0 : index
    %c0_160 = arith.constant 0 : index
    %164 = vector.load %arg10[%c0_159, %c0_160] : memref<1x8xf32, #tpu.memory_space<vmem>>, vector<1x8xf32>
    %165 = vector.broadcast %164 : vector<1x8xf32> to vector<64x8xf32>
    %166 = arith.addf %163, %165 : vector<64x8xf32>
    %167 = arith.addf %154, %166 : vector<64x8xf32>
    %168 = vector.shape_cast %167 : vector<64x8xf32> to vector<8x8x8xf32>
    %c1_161 = arith.constant 1 : index
    %c1_162 = arith.constant 1 : index
    %c0_163 = arith.constant 0 : index
    %169 = vector.load %arg18[%c1_161, %c1_162, %c0_163] : memref<10x10x8xf32, #tpu.memory_space<vmem>>, vector<8x8x8xf32>
    tpu.vector_store %arg18[%c1_161, %c1_162, %c0_163], %168 {strides = array<i32>} : memref<10x10x8xf32, #tpu.memory_space<vmem>>, vector<8x8x8xf32>,
    %c0_164 = arith.constant 0 : index
    %c0_165 = arith.constant 0 : index
    %c0_166 = arith.constant 0 : index
    %170 = vector.load %arg18[%c0_164, %c0_165, %c0_166] : memref<10x10x8xf32, #tpu.memory_space<vmem>>, vector<8x8x8xf32>
    %171 = vector.shape_cast %170 : vector<8x8x8xf32> to vector<64x8xf32>
    %172 = arith.truncf %171 : vector<64x8xf32> to vector<64x8xbf16>
    %c0_167 = arith.constant 0 : index
    %c0_168 = arith.constant 0 : index
    %c0_169 = arith.constant 0 : index
    %173 = vector.load %arg11[%c0_167, %c0_168, %c0_169] : memref<9x8x8xbf16, #tpu.memory_space<vmem>>, vector<1x8x8xbf16>
    %174 = vector.shape_cast %173 : vector<1x8x8xbf16> to vector<8x8xbf16>
    %cst_170 = arith.constant dense<0.000000e+00> : vector<64x8xf32>
    %175 = tpu.matmul %172, %174, %cst_170 {dimension_numbers = #tpu.dot_dimension_numbers<[1], [0], [0], [1], [0, 0, 1, 1], [], []>} : vector<64x8xbf16>, vector<8x8xbf16>, vector<64x8xf32> -> vector<64x8xf32>
    %c0_171 = arith.constant 0 : index
    %c1_172 = arith.constant 1 : index
    %c0_173 = arith.constant 0 : index
    %176 = vector.load %arg18[%c0_171, %c1_172, %c0_173] : memref<10x10x8xf32, #tpu.memory_space<vmem>>, vector<8x8x8xf32>
    %177 = vector.shape_cast %176 : vector<8x8x8xf32> to vector<64x8xf32>
    %178 = arith.truncf %177 : vector<64x8xf32> to vector<64x8xbf16>
    %c1_174 = arith.constant 1 : index
    %c0_175 = arith.constant 0 : index
    %c0_176 = arith.constant 0 : index
    %179 = vector.load %arg11[%c1_174, %c0_175, %c0_176] : memref<9x8x8xbf16, #tpu.memory_space<vmem>>, vector<1x8x8xbf16>
    %180 = vector.shape_cast %179 : vector<1x8x8xbf16> to vector<8x8xbf16>
    %cst_177 = arith.constant dense<0.000000e+00> : vector<64x8xf32>
    %181 = tpu.matmul %178, %180, %cst_177 {dimension_numbers = #tpu.dot_dimension_numbers<[1], [0], [0], [1], [0, 0, 1, 1], [], []>} : vector<64x8xbf16>, vector<8x8xbf16>, vector<64x8xf32> -> vector<64x8xf32>
    %182 = arith.addf %175, %181 : vector<64x8xf32>
    %c0_178 = arith.constant 0 : index
    %c2_179 = arith.constant 2 : index
    %c0_180 = arith.constant 0 : index
    %183 = vector.load %arg18[%c0_178, %c2_179, %c0_180] : memref<10x10x8xf32, #tpu.memory_space<vmem>>, vector<8x8x8xf32>
    %184 = vector.shape_cast %183 : vector<8x8x8xf32> to vector<64x8xf32>
    %185 = arith.truncf %184 : vector<64x8xf32> to vector<64x8xbf16>
    %c2_181 = arith.constant 2 : index
    %c0_182 = arith.constant 0 : index
    %c0_183 = arith.constant 0 : index
    %186 = vector.load %arg11[%c2_181, %c0_182, %c0_183] : memref<9x8x8xbf16, #tpu.memory_space<vmem>>, vector<1x8x8xbf16>
    %187 = vector.shape_cast %186 : vector<1x8x8xbf16> to vector<8x8xbf16>
    %cst_184 = arith.constant dense<0.000000e+00> : vector<64x8xf32>
    %188 = tpu.matmul %185, %187, %cst_184 {dimension_numbers = #tpu.dot_dimension_numbers<[1], [0], [0], [1], [0, 0, 1, 1], [], []>} : vector<64x8xbf16>, vector<8x8xbf16>, vector<64x8xf32> -> vector<64x8xf32>
    %189 = arith.addf %182, %188 : vector<64x8xf32>
    %c1_185 = arith.constant 1 : index
    %c0_186 = arith.constant 0 : index
    %c0_187 = arith.constant 0 : index
    %190 = vector.load %arg18[%c1_185, %c0_186, %c0_187] : memref<10x10x8xf32, #tpu.memory_space<vmem>>, vector<8x8x8xf32>
    %191 = vector.shape_cast %190 : vector<8x8x8xf32> to vector<64x8xf32>
    %192 = arith.truncf %191 : vector<64x8xf32> to vector<64x8xbf16>
    %c3_188 = arith.constant 3 : index
    %c0_189 = arith.constant 0 : index
    %c0_190 = arith.constant 0 : index
    %193 = vector.load %arg11[%c3_188, %c0_189, %c0_190] : memref<9x8x8xbf16, #tpu.memory_space<vmem>>, vector<1x8x8xbf16>
    %194 = vector.shape_cast %193 : vector<1x8x8xbf16> to vector<8x8xbf16>
    %cst_191 = arith.constant dense<0.000000e+00> : vector<64x8xf32>
    %195 = tpu.matmul %192, %194, %cst_191 {dimension_numbers = #tpu.dot_dimension_numbers<[1], [0], [0], [1], [0, 0, 1, 1], [], []>} : vector<64x8xbf16>, vector<8x8xbf16>, vector<64x8xf32> -> vector<64x8xf32>
    %196 = arith.addf %189, %195 : vector<64x8xf32>
    %c1_192 = arith.constant 1 : index
    %c1_193 = arith.constant 1 : index
    %c0_194 = arith.constant 0 : index
    %197 = vector.load %arg18[%c1_192, %c1_193, %c0_194] : memref<10x10x8xf32, #tpu.memory_space<vmem>>, vector<8x8x8xf32>
    %198 = vector.shape_cast %197 : vector<8x8x8xf32> to vector<64x8xf32>
    %199 = arith.truncf %198 : vector<64x8xf32> to vector<64x8xbf16>
    %c4_195 = arith.constant 4 : index
    %c0_196 = arith.constant 0 : index
    %c0_197 = arith.constant 0 : index
    %200 = vector.load %arg11[%c4_195, %c0_196, %c0_197] : memref<9x8x8xbf16, #tpu.memory_space<vmem>>, vector<1x8x8xbf16>
    %201 = vector.shape_cast %200 : vector<1x8x8xbf16> to vector<8x8xbf16>
    %cst_198 = arith.constant dense<0.000000e+00> : vector<64x8xf32>
    %202 = tpu.matmul %199, %201, %cst_198 {dimension_numbers = #tpu.dot_dimension_numbers<[1], [0], [0], [1], [0, 0, 1, 1], [], []>} : vector<64x8xbf16>, vector<8x8xbf16>, vector<64x8xf32> -> vector<64x8xf32>
    %203 = arith.addf %196, %202 : vector<64x8xf32>
    %c1_199 = arith.constant 1 : index
    %c2_200 = arith.constant 2 : index
    %c0_201 = arith.constant 0 : index
    %204 = vector.load %arg18[%c1_199, %c2_200, %c0_201] : memref<10x10x8xf32, #tpu.memory_space<vmem>>, vector<8x8x8xf32>
    %205 = vector.shape_cast %204 : vector<8x8x8xf32> to vector<64x8xf32>
    %206 = arith.truncf %205 : vector<64x8xf32> to vector<64x8xbf16>
    %c5_202 = arith.constant 5 : index
    %c0_203 = arith.constant 0 : index
    %c0_204 = arith.constant 0 : index
    %207 = vector.load %arg11[%c5_202, %c0_203, %c0_204] : memref<9x8x8xbf16, #tpu.memory_space<vmem>>, vector<1x8x8xbf16>
    %208 = vector.shape_cast %207 : vector<1x8x8xbf16> to vector<8x8xbf16>
    %cst_205 = arith.constant dense<0.000000e+00> : vector<64x8xf32>
    %209 = tpu.matmul %206, %208, %cst_205 {dimension_numbers = #tpu.dot_dimension_numbers<[1], [0], [0], [1], [0, 0, 1, 1], [], []>} : vector<64x8xbf16>, vector<8x8xbf16>, vector<64x8xf32> -> vector<64x8xf32>
    %210 = arith.addf %203, %209 : vector<64x8xf32>
    %c2_206 = arith.constant 2 : index
    %c0_207 = arith.constant 0 : index
    %c0_208 = arith.constant 0 : index
    %211 = vector.load %arg18[%c2_206, %c0_207, %c0_208] : memref<10x10x8xf32, #tpu.memory_space<vmem>>, vector<8x8x8xf32>
    %212 = vector.shape_cast %211 : vector<8x8x8xf32> to vector<64x8xf32>
    %213 = arith.truncf %212 : vector<64x8xf32> to vector<64x8xbf16>
    %c6_209 = arith.constant 6 : index
    %c0_210 = arith.constant 0 : index
    %c0_211 = arith.constant 0 : index
    %214 = vector.load %arg11[%c6_209, %c0_210, %c0_211] : memref<9x8x8xbf16, #tpu.memory_space<vmem>>, vector<1x8x8xbf16>
    %215 = vector.shape_cast %214 : vector<1x8x8xbf16> to vector<8x8xbf16>
    %cst_212 = arith.constant dense<0.000000e+00> : vector<64x8xf32>
    %216 = tpu.matmul %213, %215, %cst_212 {dimension_numbers = #tpu.dot_dimension_numbers<[1], [0], [0], [1], [0, 0, 1, 1], [], []>} : vector<64x8xbf16>, vector<8x8xbf16>, vector<64x8xf32> -> vector<64x8xf32>
    %217 = arith.addf %210, %216 : vector<64x8xf32>
    %c2_213 = arith.constant 2 : index
    %c1_214 = arith.constant 1 : index
    %c0_215 = arith.constant 0 : index
    %218 = vector.load %arg18[%c2_213, %c1_214, %c0_215] : memref<10x10x8xf32, #tpu.memory_space<vmem>>, vector<8x8x8xf32>
    %219 = vector.shape_cast %218 : vector<8x8x8xf32> to vector<64x8xf32>
    %220 = arith.truncf %219 : vector<64x8xf32> to vector<64x8xbf16>
    %c7_216 = arith.constant 7 : index
    %c0_217 = arith.constant 0 : index
    %c0_218 = arith.constant 0 : index
    %221 = vector.load %arg11[%c7_216, %c0_217, %c0_218] : memref<9x8x8xbf16, #tpu.memory_space<vmem>>, vector<1x8x8xbf16>
    %222 = vector.shape_cast %221 : vector<1x8x8xbf16> to vector<8x8xbf16>
    %cst_219 = arith.constant dense<0.000000e+00> : vector<64x8xf32>
    %223 = tpu.matmul %220, %222, %cst_219 {dimension_numbers = #tpu.dot_dimension_numbers<[1], [0], [0], [1], [0, 0, 1, 1], [], []>} : vector<64x8xbf16>, vector<8x8xbf16>, vector<64x8xf32> -> vector<64x8xf32>
    %224 = arith.addf %217, %223 : vector<64x8xf32>
    %c2_220 = arith.constant 2 : index
    %c2_221 = arith.constant 2 : index
    %c0_222 = arith.constant 0 : index
    %225 = vector.load %arg18[%c2_220, %c2_221, %c0_222] : memref<10x10x8xf32, #tpu.memory_space<vmem>>, vector<8x8x8xf32>
    %226 = vector.shape_cast %225 : vector<8x8x8xf32> to vector<64x8xf32>
    %227 = arith.truncf %226 : vector<64x8xf32> to vector<64x8xbf16>
    %c8_223 = arith.constant 8 : index
    %c0_224 = arith.constant 0 : index
    %c0_225 = arith.constant 0 : index
    %228 = vector.load %arg11[%c8_223, %c0_224, %c0_225] : memref<9x8x8xbf16, #tpu.memory_space<vmem>>, vector<1x8x8xbf16>
    %229 = vector.shape_cast %228 : vector<1x8x8xbf16> to vector<8x8xbf16>
    %cst_226 = arith.constant dense<0.000000e+00> : vector<64x8xf32>
    %230 = tpu.matmul %227, %229, %cst_226 {dimension_numbers = #tpu.dot_dimension_numbers<[1], [0], [0], [1], [0, 0, 1, 1], [], []>} : vector<64x8xbf16>, vector<8x8xbf16>, vector<64x8xf32> -> vector<64x8xf32>
    %231 = arith.addf %224, %230 : vector<64x8xf32>
    %c0_227 = arith.constant 0 : index
    %c0_228 = arith.constant 0 : index
    %232 = vector.load %arg12[%c0_227, %c0_228] : memref<1x8xf32, #tpu.memory_space<vmem>>, vector<1x8xf32>
    %233 = vector.broadcast %232 : vector<1x8xf32> to vector<64x8xf32>
    %234 = arith.mulf %231, %233 : vector<64x8xf32>
    %c0_229 = arith.constant 0 : index
    %c0_230 = arith.constant 0 : index
    %235 = vector.load %arg13[%c0_229, %c0_230] : memref<1x8xf32, #tpu.memory_space<vmem>>, vector<1x8xf32>
    %236 = vector.broadcast %235 : vector<1x8xf32> to vector<64x8xf32>
    %237 = arith.addf %234, %236 : vector<64x8xf32>
    %cst_231 = arith.constant 0.000000e+00 : f32
    %238 = vector.broadcast %cst_231 : f32 to vector<64x8xf32>
    %239 = arith.maximumf %237, %238 : vector<64x8xf32>
    %240 = vector.shape_cast %239 : vector<64x8xf32> to vector<8x8x8xf32>
    %c1_232 = arith.constant 1 : index
    %c1_233 = arith.constant 1 : index
    %c0_234 = arith.constant 0 : index
    %241 = vector.load %arg18[%c1_232, %c1_233, %c0_234] : memref<10x10x8xf32, #tpu.memory_space<vmem>>, vector<8x8x8xf32>
    tpu.vector_store %arg18[%c1_232, %c1_233, %c0_234], %240 {strides = array<i32>} : memref<10x10x8xf32, #tpu.memory_space<vmem>>, vector<8x8x8xf32>,
    %c0_235 = arith.constant 0 : index
    %c0_236 = arith.constant 0 : index
    %c0_237 = arith.constant 0 : index
    %242 = vector.load %arg18[%c0_235, %c0_236, %c0_237] : memref<10x10x8xf32, #tpu.memory_space<vmem>>, vector<8x8x8xf32>
    %243 = vector.shape_cast %242 : vector<8x8x8xf32> to vector<64x8xf32>
    %244 = arith.truncf %243 : vector<64x8xf32> to vector<64x8xbf16>
    %c0_238 = arith.constant 0 : index
    %c0_239 = arith.constant 0 : index
    %c0_240 = arith.constant 0 : index
    %245 = vector.load %arg14[%c0_238, %c0_239, %c0_240] : memref<9x8x8xbf16, #tpu.memory_space<vmem>>, vector<1x8x8xbf16>
    %246 = vector.shape_cast %245 : vector<1x8x8xbf16> to vector<8x8xbf16>
    %cst_241 = arith.constant dense<0.000000e+00> : vector<64x8xf32>
    %247 = tpu.matmul %244, %246, %cst_241 {dimension_numbers = #tpu.dot_dimension_numbers<[1], [0], [0], [1], [0, 0, 1, 1], [], []>} : vector<64x8xbf16>, vector<8x8xbf16>, vector<64x8xf32> -> vector<64x8xf32>
    %c0_242 = arith.constant 0 : index
    %c1_243 = arith.constant 1 : index
    %c0_244 = arith.constant 0 : index
    %248 = vector.load %arg18[%c0_242, %c1_243, %c0_244] : memref<10x10x8xf32, #tpu.memory_space<vmem>>, vector<8x8x8xf32>
    %249 = vector.shape_cast %248 : vector<8x8x8xf32> to vector<64x8xf32>
    %250 = arith.truncf %249 : vector<64x8xf32> to vector<64x8xbf16>
    %c1_245 = arith.constant 1 : index
    %c0_246 = arith.constant 0 : index
    %c0_247 = arith.constant 0 : index
    %251 = vector.load %arg14[%c1_245, %c0_246, %c0_247] : memref<9x8x8xbf16, #tpu.memory_space<vmem>>, vector<1x8x8xbf16>
    %252 = vector.shape_cast %251 : vector<1x8x8xbf16> to vector<8x8xbf16>
    %cst_248 = arith.constant dense<0.000000e+00> : vector<64x8xf32>
    %253 = tpu.matmul %250, %252, %cst_248 {dimension_numbers = #tpu.dot_dimension_numbers<[1], [0], [0], [1], [0, 0, 1, 1], [], []>} : vector<64x8xbf16>, vector<8x8xbf16>, vector<64x8xf32> -> vector<64x8xf32>
    %254 = arith.addf %247, %253 : vector<64x8xf32>
    %c0_249 = arith.constant 0 : index
    %c2_250 = arith.constant 2 : index
    %c0_251 = arith.constant 0 : index
    %255 = vector.load %arg18[%c0_249, %c2_250, %c0_251] : memref<10x10x8xf32, #tpu.memory_space<vmem>>, vector<8x8x8xf32>
    %256 = vector.shape_cast %255 : vector<8x8x8xf32> to vector<64x8xf32>
    %257 = arith.truncf %256 : vector<64x8xf32> to vector<64x8xbf16>
    %c2_252 = arith.constant 2 : index
    %c0_253 = arith.constant 0 : index
    %c0_254 = arith.constant 0 : index
    %258 = vector.load %arg14[%c2_252, %c0_253, %c0_254] : memref<9x8x8xbf16, #tpu.memory_space<vmem>>, vector<1x8x8xbf16>
    %259 = vector.shape_cast %258 : vector<1x8x8xbf16> to vector<8x8xbf16>
    %cst_255 = arith.constant dense<0.000000e+00> : vector<64x8xf32>
    %260 = tpu.matmul %257, %259, %cst_255 {dimension_numbers = #tpu.dot_dimension_numbers<[1], [0], [0], [1], [0, 0, 1, 1], [], []>} : vector<64x8xbf16>, vector<8x8xbf16>, vector<64x8xf32> -> vector<64x8xf32>
    %261 = arith.addf %254, %260 : vector<64x8xf32>
    %c1_256 = arith.constant 1 : index
    %c0_257 = arith.constant 0 : index
    %c0_258 = arith.constant 0 : index
    %262 = vector.load %arg18[%c1_256, %c0_257, %c0_258] : memref<10x10x8xf32, #tpu.memory_space<vmem>>, vector<8x8x8xf32>
    %263 = vector.shape_cast %262 : vector<8x8x8xf32> to vector<64x8xf32>
    %264 = arith.truncf %263 : vector<64x8xf32> to vector<64x8xbf16>
    %c3_259 = arith.constant 3 : index
    %c0_260 = arith.constant 0 : index
    %c0_261 = arith.constant 0 : index
    %265 = vector.load %arg14[%c3_259, %c0_260, %c0_261] : memref<9x8x8xbf16, #tpu.memory_space<vmem>>, vector<1x8x8xbf16>
    %266 = vector.shape_cast %265 : vector<1x8x8xbf16> to vector<8x8xbf16>
    %cst_262 = arith.constant dense<0.000000e+00> : vector<64x8xf32>
    %267 = tpu.matmul %264, %266, %cst_262 {dimension_numbers = #tpu.dot_dimension_numbers<[1], [0], [0], [1], [0, 0, 1, 1], [], []>} : vector<64x8xbf16>, vector<8x8xbf16>, vector<64x8xf32> -> vector<64x8xf32>
    %268 = arith.addf %261, %267 : vector<64x8xf32>
    %c1_263 = arith.constant 1 : index
    %c1_264 = arith.constant 1 : index
    %c0_265 = arith.constant 0 : index
    %269 = vector.load %arg18[%c1_263, %c1_264, %c0_265] : memref<10x10x8xf32, #tpu.memory_space<vmem>>, vector<8x8x8xf32>
    %270 = vector.shape_cast %269 : vector<8x8x8xf32> to vector<64x8xf32>
    %271 = arith.truncf %270 : vector<64x8xf32> to vector<64x8xbf16>
    %c4_266 = arith.constant 4 : index
    %c0_267 = arith.constant 0 : index
    %c0_268 = arith.constant 0 : index
    %272 = vector.load %arg14[%c4_266, %c0_267, %c0_268] : memref<9x8x8xbf16, #tpu.memory_space<vmem>>, vector<1x8x8xbf16>
    %273 = vector.shape_cast %272 : vector<1x8x8xbf16> to vector<8x8xbf16>
    %cst_269 = arith.constant dense<0.000000e+00> : vector<64x8xf32>
    %274 = tpu.matmul %271, %273, %cst_269 {dimension_numbers = #tpu.dot_dimension_numbers<[1], [0], [0], [1], [0, 0, 1, 1], [], []>} : vector<64x8xbf16>, vector<8x8xbf16>, vector<64x8xf32> -> vector<64x8xf32>
    %275 = arith.addf %268, %274 : vector<64x8xf32>
    %c1_270 = arith.constant 1 : index
    %c2_271 = arith.constant 2 : index
    %c0_272 = arith.constant 0 : index
    %276 = vector.load %arg18[%c1_270, %c2_271, %c0_272] : memref<10x10x8xf32, #tpu.memory_space<vmem>>, vector<8x8x8xf32>
    %277 = vector.shape_cast %276 : vector<8x8x8xf32> to vector<64x8xf32>
    %278 = arith.truncf %277 : vector<64x8xf32> to vector<64x8xbf16>
    %c5_273 = arith.constant 5 : index
    %c0_274 = arith.constant 0 : index
    %c0_275 = arith.constant 0 : index
    %279 = vector.load %arg14[%c5_273, %c0_274, %c0_275] : memref<9x8x8xbf16, #tpu.memory_space<vmem>>, vector<1x8x8xbf16>
    %280 = vector.shape_cast %279 : vector<1x8x8xbf16> to vector<8x8xbf16>
    %cst_276 = arith.constant dense<0.000000e+00> : vector<64x8xf32>
    %281 = tpu.matmul %278, %280, %cst_276 {dimension_numbers = #tpu.dot_dimension_numbers<[1], [0], [0], [1], [0, 0, 1, 1], [], []>} : vector<64x8xbf16>, vector<8x8xbf16>, vector<64x8xf32> -> vector<64x8xf32>
    %282 = arith.addf %275, %281 : vector<64x8xf32>
    %c2_277 = arith.constant 2 : index
    %c0_278 = arith.constant 0 : index
    %c0_279 = arith.constant 0 : index
    %283 = vector.load %arg18[%c2_277, %c0_278, %c0_279] : memref<10x10x8xf32, #tpu.memory_space<vmem>>, vector<8x8x8xf32>
    %284 = vector.shape_cast %283 : vector<8x8x8xf32> to vector<64x8xf32>
    %285 = arith.truncf %284 : vector<64x8xf32> to vector<64x8xbf16>
    %c6_280 = arith.constant 6 : index
    %c0_281 = arith.constant 0 : index
    %c0_282 = arith.constant 0 : index
    %286 = vector.load %arg14[%c6_280, %c0_281, %c0_282] : memref<9x8x8xbf16, #tpu.memory_space<vmem>>, vector<1x8x8xbf16>
    %287 = vector.shape_cast %286 : vector<1x8x8xbf16> to vector<8x8xbf16>
    %cst_283 = arith.constant dense<0.000000e+00> : vector<64x8xf32>
    %288 = tpu.matmul %285, %287, %cst_283 {dimension_numbers = #tpu.dot_dimension_numbers<[1], [0], [0], [1], [0, 0, 1, 1], [], []>} : vector<64x8xbf16>, vector<8x8xbf16>, vector<64x8xf32> -> vector<64x8xf32>
    %289 = arith.addf %282, %288 : vector<64x8xf32>
    %c2_284 = arith.constant 2 : index
    %c1_285 = arith.constant 1 : index
    %c0_286 = arith.constant 0 : index
    %290 = vector.load %arg18[%c2_284, %c1_285, %c0_286] : memref<10x10x8xf32, #tpu.memory_space<vmem>>, vector<8x8x8xf32>
    %291 = vector.shape_cast %290 : vector<8x8x8xf32> to vector<64x8xf32>
    %292 = arith.truncf %291 : vector<64x8xf32> to vector<64x8xbf16>
    %c7_287 = arith.constant 7 : index
    %c0_288 = arith.constant 0 : index
    %c0_289 = arith.constant 0 : index
    %293 = vector.load %arg14[%c7_287, %c0_288, %c0_289] : memref<9x8x8xbf16, #tpu.memory_space<vmem>>, vector<1x8x8xbf16>
    %294 = vector.shape_cast %293 : vector<1x8x8xbf16> to vector<8x8xbf16>
    %cst_290 = arith.constant dense<0.000000e+00> : vector<64x8xf32>
    %295 = tpu.matmul %292, %294, %cst_290 {dimension_numbers = #tpu.dot_dimension_numbers<[1], [0], [0], [1], [0, 0, 1, 1], [], []>} : vector<64x8xbf16>, vector<8x8xbf16>, vector<64x8xf32> -> vector<64x8xf32>
    %296 = arith.addf %289, %295 : vector<64x8xf32>
    %c2_291 = arith.constant 2 : index
    %c2_292 = arith.constant 2 : index
    %c0_293 = arith.constant 0 : index
    %297 = vector.load %arg18[%c2_291, %c2_292, %c0_293] : memref<10x10x8xf32, #tpu.memory_space<vmem>>, vector<8x8x8xf32>
    %298 = vector.shape_cast %297 : vector<8x8x8xf32> to vector<64x8xf32>
    %299 = arith.truncf %298 : vector<64x8xf32> to vector<64x8xbf16>
    %c8_294 = arith.constant 8 : index
    %c0_295 = arith.constant 0 : index
    %c0_296 = arith.constant 0 : index
    %300 = vector.load %arg14[%c8_294, %c0_295, %c0_296] : memref<9x8x8xbf16, #tpu.memory_space<vmem>>, vector<1x8x8xbf16>
    %301 = vector.shape_cast %300 : vector<1x8x8xbf16> to vector<8x8xbf16>
    %cst_297 = arith.constant dense<0.000000e+00> : vector<64x8xf32>
    %302 = tpu.matmul %299, %301, %cst_297 {dimension_numbers = #tpu.dot_dimension_numbers<[1], [0], [0], [1], [0, 0, 1, 1], [], []>} : vector<64x8xbf16>, vector<8x8xbf16>, vector<64x8xf32> -> vector<64x8xf32>
    %303 = arith.addf %296, %302 : vector<64x8xf32>
    %c0_298 = arith.constant 0 : index
    %c0_299 = arith.constant 0 : index
    %304 = vector.load %arg15[%c0_298, %c0_299] : memref<1x8xf32, #tpu.memory_space<vmem>>, vector<1x8xf32>
    %305 = vector.broadcast %304 : vector<1x8xf32> to vector<64x8xf32>
    %306 = arith.mulf %303, %305 : vector<64x8xf32>
    %c0_300 = arith.constant 0 : index
    %c0_301 = arith.constant 0 : index
    %307 = vector.load %arg16[%c0_300, %c0_301] : memref<1x8xf32, #tpu.memory_space<vmem>>, vector<1x8xf32>
    %308 = vector.broadcast %307 : vector<1x8xf32> to vector<64x8xf32>
    %309 = arith.addf %306, %308 : vector<64x8xf32>
    %310 = arith.addf %309, %167 : vector<64x8xf32>
    %311 = vector.shape_cast %310 : vector<64x8xf32> to vector<8x8x8xf32>
    %c0_302 = arith.constant 0 : index
    %c0_303 = arith.constant 0 : index
    %c0_304 = arith.constant 0 : index
    %c0_305 = arith.constant 0 : index
    %312 = vector.load %arg17[%c0_302, %c0_303, %c0_304, %c0_305] : memref<1x8x8x8xf32, #tpu.memory_space<vmem>>, vector<1x8x8x8xf32>
    %313 = vector.shape_cast %312 : vector<1x8x8x8xf32> to vector<8x8x8xf32>
    %314 = vector.shape_cast %311 : vector<8x8x8xf32> to vector<1x8x8x8xf32>
    tpu.vector_store %arg17[%c0_302, %c0_303, %c0_304, %c0_305], %314 {strides = array<i32>} : memref<1x8x8x8xf32, #tpu.memory_space<vmem>>, vector<1x8x8x8xf32>,
    return
  }
  func.func @transform_0(%arg0: i32) -> (i32, i32, i32, i32) {
    %c0_i32 = arith.constant 0 : i32
    %c0_i32_0 = arith.constant 0 : i32
    %c0_i32_1 = arith.constant 0 : i32
    %c0_i32_2 = arith.constant 0 : i32
    return %arg0, %c0_i32, %c0_i32_0, %c0_i32_1 : i32, i32, i32, i32
  }
  func.func @transform_1(%arg0: i32) -> (i32, i32, i32) {
    %c0_i32 = arith.constant 0 : i32
    %c0_i32_0 = arith.constant 0 : i32
    %c0_i32_1 = arith.constant 0 : i32
    %c0_i32_2 = arith.constant 0 : i32
    return %c0_i32, %c0_i32_0, %c0_i32_1 : i32, i32, i32
  }
  func.func @transform_2(%arg0: i32) -> (i32, i32) {
    %c0_i32 = arith.constant 0 : i32
    %c0_i32_0 = arith.constant 0 : i32
    %c0_i32_1 = arith.constant 0 : i32
    return %c0_i32, %c0_i32_0 : i32, i32
  }
  func.func @transform_3(%arg0: i32) -> (i32, i32) {
    %c0_i32 = arith.constant 0 : i32
    %c0_i32_0 = arith.constant 0 : i32
    %c0_i32_1 = arith.constant 0 : i32
    return %c0_i32, %c0_i32_0 : i32, i32
  }
  func.func @transform_4(%arg0: i32) -> (i32, i32, i32) {
    %c0_i32 = arith.constant 0 : i32
    %c0_i32_0 = arith.constant 0 : i32
    %c0_i32_1 = arith.constant 0 : i32
    %c0_i32_2 = arith.constant 0 : i32
    return %c0_i32, %c0_i32_0, %c0_i32_1 : i32, i32, i32
  }
  func.func @transform_5(%arg0: i32) -> (i32, i32) {
    %c0_i32 = arith.constant 0 : i32
    %c0_i32_0 = arith.constant 0 : i32
    %c0_i32_1 = arith.constant 0 : i32
    return %c0_i32, %c0_i32_0 : i32, i32
  }
  func.func @transform_6(%arg0: i32) -> (i32, i32) {
    %c0_i32 = arith.constant 0 : i32
    %c0_i32_0 = arith.constant 0 : i32
    %c0_i32_1 = arith.constant 0 : i32
    return %c0_i32, %c0_i32_0 : i32, i32
  }
  func.func @transform_7(%arg0: i32) -> (i32, i32) {
    %c0_i32 = arith.constant 0 : i32
    %c0_i32_0 = arith.constant 0 : i32
    %c0_i32_1 = arith.constant 0 : i32
    return %c0_i32, %c0_i32_0 : i32, i32
  }
  func.func @transform_8(%arg0: i32) -> (i32, i32) {
    %c0_i32 = arith.constant 0 : i32
    %c0_i32_0 = arith.constant 0 : i32
    %c0_i32_1 = arith.constant 0 : i32
    return %c0_i32, %c0_i32_0 : i32, i32
  }
  func.func @transform_9(%arg0: i32) -> (i32, i32) {
    %c0_i32 = arith.constant 0 : i32
    %c0_i32_0 = arith.constant 0 : i32
    %c0_i32_1 = arith.constant 0 : i32
    return %c0_i32, %c0_i32_0 : i32, i32
  }
  func.func @transform_10(%arg0: i32) -> (i32, i32, i32) {
    %c0_i32 = arith.constant 0 : i32
    %c0_i32_0 = arith.constant 0 : i32
    %c0_i32_1 = arith.constant 0 : i32
    %c0_i32_2 = arith.constant 0 : i32
    return %c0_i32, %c0_i32_0, %c0_i32_1 : i32, i32, i32
  }
  func.func @transform_11(%arg0: i32) -> (i32, i32) {
    %c0_i32 = arith.constant 0 : i32
    %c0_i32_0 = arith.constant 0 : i32
    %c0_i32_1 = arith.constant 0 : i32
    return %c0_i32, %c0_i32_0 : i32, i32
  }
  func.func @transform_12(%arg0: i32) -> (i32, i32) {
    %c0_i32 = arith.constant 0 : i32
    %c0_i32_0 = arith.constant 0 : i32
    %c0_i32_1 = arith.constant 0 : i32
    return %c0_i32, %c0_i32_0 : i32, i32
  }
  func.func @transform_13(%arg0: i32) -> (i32, i32, i32) {
    %c0_i32 = arith.constant 0 : i32
    %c0_i32_0 = arith.constant 0 : i32
    %c0_i32_1 = arith.constant 0 : i32
    %c0_i32_2 = arith.constant 0 : i32
    return %c0_i32, %c0_i32_0, %c0_i32_1 : i32, i32, i32
  }
  func.func @transform_14(%arg0: i32) -> (i32, i32) {
    %c0_i32 = arith.constant 0 : i32
    %c0_i32_0 = arith.constant 0 : i32
    %c0_i32_1 = arith.constant 0 : i32
    return %c0_i32, %c0_i32_0 : i32, i32
  }
  func.func @transform_15(%arg0: i32) -> (i32, i32) {
    %c0_i32 = arith.constant 0 : i32
    %c0_i32_0 = arith.constant 0 : i32
    %c0_i32_1 = arith.constant 0 : i32
    return %c0_i32, %c0_i32_0 : i32, i32
  }
  func.func @transform_16(%arg0: i32) -> (i32, i32, i32, i32) {
    %c0_i32 = arith.constant 0 : i32
    %c0_i32_0 = arith.constant 0 : i32
    %c0_i32_1 = arith.constant 0 : i32
    %c0_i32_2 = arith.constant 0 : i32
    return %arg0, %c0_i32, %c0_i32_0, %c0_i32_1 : i32, i32, i32, i32
  }
}

</mosaic_0001>

<bundles_post_ra>
// kernel: tpu_custom_call.1
= control target key start
LH: loop header
LB: loop body
LE: loop exit
PB: predicated region body
PF: predicated region fallthrough
CT: control target
= control target key end

     0   :  { %s6838_s0 = inlined_call_operand.vmem [shape: f32[2,18,18,4], index: 0, kind: input, shape index: {}]   ;;  %s6839_s1 = inlined_call_operand.vmem [shape: bf16[9,4,8], index: 1, kind: input, shape index: {}]   ;;  %s6840_s2 = inlined_call_operand.vmem [shape: f32[1,8], index: 2, kind: input, shape index: {}]   ;;  %s6841_s3 = inlined_call_operand.vmem [shape: f32[1,8], index: 3, kind: input, shape index: {}]   ;;  %s6842_s4 = inlined_call_operand.vmem [shape: bf16[9,8,8], index: 4, kind: input, shape index: {}]   ;;  %s6843_s5 = inlined_call_operand.vmem [shape: f32[1,8], index: 5, kind: input, shape index: {}]   ;;  %s6844_s6 = inlined_call_operand.vmem [shape: f32[1,8], index: 6, kind: input, shape index: {}]   ;;  %s6845_s7 = inlined_call_operand.vmem [shape: bf16[4,8], index: 7, kind: input, shape index: {}]   ;;  %s6846_s8 = inlined_call_operand.vmem [shape: f32[1,8], index: 8, kind: input, shape index: {}]   ;;  %s6847_s9 = inlined_call_operand.vmem [shape: f32[1,8], index: 9, kind: input, shape index: {}]   ;;  %s6848_s10 = inlined_call_operand.vmem [shape: bf16[9,8,8], index: 10, kind: input, shape index: {}]   ;;  %s6849_s11 = inlined_call_operand.vmem [shape: f32[1,8], index: 11, kind: input, shape index: {}]   ;;  %s6850_s12 = inlined_call_operand.vmem [shape: f32[1,8], index: 12, kind: input, shape index: {}]   ;;  %s6851_s13 = inlined_call_operand.vmem [shape: bf16[9,8,8], index: 13, kind: input, shape index: {}]   ;;  %s6852_s14 = inlined_call_operand.vmem [shape: f32[1,8], index: 14, kind: input, shape index: {}]   ;;  %s6853_s15 = inlined_call_operand.vmem [shape: f32[1,8], index: 15, kind: input, shape index: {}]   ;;  %s6854_s16 = inlined_call_operand.hbm [shape: f32[2,8,8,8], index: 16, kind: output, shape index: {}]  }
   0x1   :  { %6856 = sst [smem:[#allocation8_spill]] %s6838_s0 }
   0x2   :  { %6857 = sst [smem:[#allocation9_spill]] %s6839_s1 }
   0x3   :  { %6858 = sst [smem:[#allocation10_spill]] %s6840_s2 }
   0x4   :  { %21 = vsyncpa [#allocation4], 0 }
   0x5   :  { %23 = vsyncpa [#allocation4 + $0x1], 0  ;;  %s5986_s21 = smov 0   ;;  %s5988_s22 = smov 0  }
   0x6   :  { %s5990_s23 = smov 0   ;;  %s5992_s24 = smov 0  }
   0x7 LB: > { %6859 = sst [smem:[#allocation6_spill]] %s5891_s23  ;;  %s6007_s25 = sadd.s32 4294967295, %s5895_s24   ;;  %s5895_s24 = sphi %s5992_s24, %s6870_s24   ;;  %s5891_s23 = sphi %s5990_s23, %s6867_s23   ;;  %s5887_s22 = sphi %s5988_s22, %s6869_s22   ;;  %s5883_s21 = sphi %s5986_s21, %s6868_s21  }
   0x8   : > { %s4658_s26 = sadd.s32 4294967294, %s5895_s24   ;;  %s6011_s27 = sadd.s32 1, %s5895_s24  }
   0x9   : > { %s377_s28 = sadd.s32 1, %s5891_s23  ;;  %s374_s29 = ssub.s32 %s5895_s24, %s6011_s27 }
   0xa   : > { %p387_p0 = scmp.ne.s32.totalorder %s5891_s23, %s5887_s22  ;;  %p375_p1 = scmp.eq.s32.totalorder %s374_s29, 0 }
   0xb   : > { %p388_p2 = scmp.eq.s32.totalorder %s6007_s25, 1  ;;  %p393_p3 = scmp.ne.s32.totalorder %s5887_s22, %s5883_s21 }
   0xc   : > { %p394_p4 = scmp.eq.s32.totalorder %s4658_s26, 1  ;;  %p4661_p7 = scmp.ge.s32.totalorder %s5895_s24, 1 }
   0xd   : > { %s6022_s30 = scalar_select %p375_p1, %s5891_s23, %s377_s28  }
   0xe   : > { %p6024_p5 = por %p388_p2, %p387_p0  ;;  %p6028_p6 = por %p394_p4, %p393_p3 }
   0xf   : > { %6860 = sst [smem:[#allocation7_spill]] %s6022_s30  ;;  %p465_p8 = scmp.lt.s32.totalorder %s5895_s24, 3 }
  0x11   : > { %p466_p9 = pnand %p4661_p7, %p465_p8 }
  0x12   : > { %s6863_s1 = sld [smem:[#allocation9_spill]] (!%p466_p9)  ;;  %vm604_vm0 = vcmask (!%p466_p9), 1041408   ;;  %p515_p10 = scmp.lt.s32.totalorder (!%p466_p9), %s6007_s25, 1  ;;  %vm591_vm1 = vcmask (!%p466_p9), 31744   ;;  %vm521_vm2 = vcmask (!%p466_p9), 64512   ;;  %vm523_vm3 = vcmask (!%p466_p9), 58368  }
  0x13   : > { %469 = sbr.rel (%p466_p9) target bundleno = 1482 (0x5ca), region = 84  ;;  %s6864_s30 = sld [smem:[#allocation8_spill]] (!%p466_p9)  ;;  %vm528_vm4 = vcmask (!%p466_p9), 57344   ;;  %vm1609_vm5 = vcmask (!%p466_p9), 1043456  }
  0x14   : > { %s6865_s2 = sld [smem:[#allocation10_spill]] (!%p466_p9)  ;;  %s512_s20 = sand.u32 (!%p466_p9), 1, %s5887_s22  }
  0x15   : > { %s4938_s19 = sshll.u32 (!%p466_p9), %s6007_s25, 10 }
  0x18   : > { %v4679_v0 = vld [vmem:[%s6863_s1 + $0x2] sm:$0x3] (!%p466_p9)  ;;  %v568_v2 = vld [vmem:[%s6863_s1] sm:$0x3] (!%p466_p9)  ;;  %v4696_v13 = vld [vmem:[%s6863_s1 + $0x4] sm:$0x3] (!%p466_p9) }
  0x19   : > { %5752 = vmatprep.subr.msk.bf16.mxu0 (!%p466_p9), %vm604_vm0, %v4679_v0  ;;  %v606_v1 = vsel (!%p466_p9), %vm604_vm0, %v4679_v0, 0  ;;  %5753 = vmatprep.subr.msk.bf16.mxu1 (!%p466_p9), %vm604_vm0, %v4679_v0  ;;  %v686_v11 = vsel (!%p466_p9), %vm604_vm0, %v568_v2, 0  ;;  %v788_v20 = vsel (!%p466_p9), %vm604_vm0, %v4696_v13, 0  ;;  %v4709_v21 = vld [vmem:[%s6863_s1 + $0x6] sm:$0x3] (!%p466_p9) }
  0x1a   : > { %5125 = vmatpush3.bf16.msra.mxu0 %v606_v1  ;;  %s516_s28 = scalar_select %p515_p10, %s6007_s25, 1  ;;  %5495 = vmatpush3.bf16.msra.mxu1 %v606_v1  ;;  %v898_v40 = vsel %vm604_vm0, %v4709_v21, 0  ;;  %v4722_v41 = vld [vmem:[%s6863_s1 + $0x8] sm:$0x3]  ;;  %v4735_v55 = vld [vmem:[%s6863_s1 + $0xa] sm:$0x3] }
  0x1b   : > { %5754 = vmatprep.subr.msk.bf16.mxu0 %vm604_vm0, %v568_v2  ;;  %v1008_v54 = vsel %vm604_vm0, %v4722_v41, 0  ;;  %s6797_s25 = scalar_lea.sflag [#allocation4], %s512_s20 }
  0x1c   : > { %s5790_s29 = smul.u32 432, %s516_s28 }
  0x1e   : > { %s6049_s23 = scalar_lea.vmem %s6864_s30, %s5790_s29  ;;  %s4662_s29 = sshll.u32 %s512_s20, 6 }
  0x1f   : > { %v4671_v3 = vld [vmem:[%s6049_s23 + $0x1] ss:$2 sm:$0xff]  ;;  %v4672_v4 = vld [vmem:[%s6049_s23 + $0x31] ss:$2 sm:$0xff]  ;;  %v549_v8 = vld [vmem:[%s6049_s23] ss:$2 sm:$0xff] }
  0x20   : > { %v4673_v5 = vld [vmem:[%s6049_s23 + $0x61] ss:$2 sm:$0xff]  ;;  %v585_v6 = vpack.c.bf16 %v4672_v4, %v4671_v3  ;;  %v4674_v7 = vld [vmem:[%s6049_s23 + $0x91] ss:$2 sm:$0xff]  ;;  %v4664_v9 = vld [vmem:[%s6049_s23 + $0x30] ss:$2 sm:$0xff] }
  0x21   : > { %v586_v10 = vpack.c.bf16 %v4674_v7, %v4673_v5  ;;  %v564_v12 = vpack.c.bf16 %v4664_v9, %v549_v8  ;;  %v4665_v14 = vld [vmem:[%s6049_s23 + $0x60] ss:$2 sm:$0xff]  ;;  %v4666_v15 = vld [vmem:[%s6049_s23 + $0x90] ss:$2 sm:$0xff]  ;;  %v4675_v28 = vld [vmem:[%s6049_s23 + $0xc1] ss:$2 sm:$0xff] }
  0x22   : > { %5126 = vmatprep.mubr.msk.bf16.mxu0 %vm591_vm1, %v585_v6  ;;  %v4667_v16 = vld [vmem:[%s6049_s23 + $0xc0] ss:$2 sm:$0xff]  ;;  %v4668_v17 = vld [vmem:[%s6049_s23 + $0xf0] ss:$2 sm:$0xff]  ;;  %v565_v18 = vpack.c.bf16 %v4666_v15, %v4665_v14  ;;  %v4676_v29 = vld [vmem:[%s6049_s23 + $0xf1] ss:$2 sm:$0xff] }
  0x23   : > { %5127 = vmatmul.mubr.msk.bf16.vlgmr.msra.gmra.mrb[0].mxu0 %vm591_vm1, %v586_v10  ;;  %v566_v19 = vpack.c.bf16 %v4668_v17, %v4667_v16  ;;  %v4669_v22 = vld [vmem:[%s6049_s23 + $0x120] ss:$2 sm:$0xff]  ;;  %v4670_v23 = vld [vmem:[%s6049_s23 + $0x150] ss:$2 sm:$0xff]  ;;  %v587_v30 = vpack.c.bf16 %v4676_v29, %v4675_v28  ;;  %v4677_v31 = vld [vmem:[%s6049_s23 + $0x121] ss:$2 sm:$0xff] }
  0x24   : > { %5135 = vmatpush3.bf16.msra.mxu0 %v686_v11  ;;  %5136 = vmatprep.mubr.msk.bf16.mxu0 %vm591_vm1, %v564_v12  ;;  %v4688_v24 = vld [vmem:[%s6049_s23 + $0x2] ss:$2 sm:$0xff]  ;;  %v4689_v25 = vld [vmem:[%s6049_s23 + $0x32] ss:$2 sm:$0xff]  ;;  %v567_v26 = vpack.c.bf16 %v4670_v23, %v4669_v22  ;;  %v4678_v32 = vld [vmem:[%s6049_s23 + $0x151] ss:$2 sm:$0xff] }
  0x25   : > { %5755 = vmatprep.subr.msk.bf16.mxu0 %vm604_vm0, %v4696_v13  ;;  %v769_v27 = vpack.c.bf16 %v4689_v25, %v4688_v24  ;;  %v588_v33 = vpack.c.bf16 %v4678_v32, %v4677_v31  ;;  %5130 = vmatprep.mubr.msk.bf16.mxu1 %vm591_vm1, %v587_v30  ;;  %v4690_v34 = vld [vmem:[%s6049_s23 + $0x62] ss:$2 sm:$0xff]  ;;  %v4691_v35 = vld [vmem:[%s6049_s23 + $0x92] ss:$2 sm:$0xff]  ;;  %v4714_v58 = vld [vmem:[%s6049_s23 + $0x19] ss:$2 sm:$0xff] }
  0x26   : > { %v4692_v36 = vld [vmem:[%s6049_s23 + $0xc2] ss:$2 sm:$0xff]  ;;  %v4693_v37 = vld [vmem:[%s6049_s23 + $0xf2] ss:$2 sm:$0xff]  ;;  %v770_v38 = vpack.c.bf16 %v4691_v35, %v4690_v34  ;;  %v4715_v59 = vld [vmem:[%s6049_s23 + $0x49] ss:$2 sm:$0xff] }
  0x27   : > { %5131 = vmatmul.mubr.msk.bf16.vlgmr.msra.gmra.mrb[0].mxu1 %vm591_vm1, %v588_v33  ;;  %v771_v39 = vpack.c.bf16 %v4693_v37, %v4692_v36  ;;  %v4694_v42 = vld [vmem:[%s6049_s23 + $0x122] ss:$2 sm:$0xff]  ;;  %v4695_v43 = vld [vmem:[%s6049_s23 + $0x152] ss:$2 sm:$0xff]  ;;  %v989_v61 = vpack.c.bf16 %v4715_v59, %v4714_v58  ;;  %v4716_v62 = vld [vmem:[%s6049_s23 + $0x79] ss:$2 sm:$0xff] }
  0x28   : > { %v4701_v44 = vld [vmem:[%s6049_s23 + $0x18] ss:$2 sm:$0xff]  ;;  %v4702_v45 = vld [vmem:[%s6049_s23 + $0x48] ss:$2 sm:$0xff]  ;;  %v772_v46 = vpack.c.bf16 %v4695_v43, %v4694_v42  ;;  %v4717_v63 = vld [vmem:[%s6049_s23 + $0xa9] ss:$2 sm:$0xff] }
  0x29   : > { %v879_v47 = vpack.c.bf16 %v4702_v45, %v4701_v44  ;;  %v4703_v48 = vld [vmem:[%s6049_s23 + $0x78] ss:$2 sm:$0xff]  ;;  %v4704_v49 = vld [vmem:[%s6049_s23 + $0xa8] ss:$2 sm:$0xff]  ;;  %v4718_v0 = vld [vmem:[%s6049_s23 + $0xd9] ss:$2 sm:$0xff]  ;;  %v990_v2 = vpack.c.bf16 %v4717_v63, %v4716_v62 }
  0x2a   : > { %v4705_v50 = vld [vmem:[%s6049_s23 + $0xd8] ss:$2 sm:$0xff]  ;;  %v4706_v51 = vld [vmem:[%s6049_s23 + $0x108] ss:$2 sm:$0xff]  ;;  %v880_v52 = vpack.c.bf16 %v4704_v49, %v4703_v48  ;;  %v4719_v1 = vld [vmem:[%s6049_s23 + $0x109] ss:$2 sm:$0xff] }
  0x2b   : > { %v881_v53 = vpack.c.bf16 %v4706_v51, %v4705_v50  ;;  %v4707_v56 = vld [vmem:[%s6049_s23 + $0x138] ss:$2 sm:$0xff]  ;;  %v4708_v57 = vld [vmem:[%s6049_s23 + $0x168] ss:$2 sm:$0xff]  ;;  %v991_v3 = vpack.c.bf16 %v4719_v1, %v4718_v0  ;;  %v1118_v4 = vsel %vm604_vm0, %v4735_v55, 0  ;;  %v5897_v62 = vmov 0.0  }
  0x2c   : > { %v882_v60 = vpack.c.bf16 %v4708_v57, %v4707_v56  ;;  %v4748_v5 = vld [vmem:[%s6863_s1 + $0xc] sm:$0x3]  ;;  %v4720_v6 = vld [vmem:[%s6049_s23 + $0x139] ss:$2 sm:$0xff]  ;;  %v4727_v8 = vld [vmem:[%s6049_s23 + $0x1a] ss:$2 sm:$0xff] }
  0x2d   : > { %v4721_v7 = vld [vmem:[%s6049_s23 + $0x169] ss:$2 sm:$0xff]  ;;  %v4728_v9 = vld [vmem:[%s6049_s23 + $0x4a] ss:$2 sm:$0xff]  ;;  %v4729_v12 = vld [vmem:[%s6049_s23 + $0x7a] ss:$2 sm:$0xff] }
  0x2e   : > { %v992_v10 = vpack.c.bf16 %v4721_v7, %v4720_v6  ;;  %v1099_v11 = vpack.c.bf16 %v4728_v9, %v4727_v8  ;;  %v4730_v13 = vld [vmem:[%s6049_s23 + $0xaa] ss:$2 sm:$0xff]  ;;  %v4731_v14 = vld [vmem:[%s6049_s23 + $0xda] ss:$2 sm:$0xff]  ;;  %v4753_v36 = vld [vmem:[%s6049_s23 + $0x31] ss:$2 sm:$0xff] }
  0x2f   : > { %5137 = vmatmul.mubr.msk.bf16.vlgmr.msra.gmra.mrb[0].mxu0 %vm591_vm1, %v565_v18  ;;  %v4732_v15 = vld [vmem:[%s6049_s23 + $0x10a] ss:$2 sm:$0xff]  ;;  %v1100_v16 = vpack.c.bf16 %v4730_v13, %v4729_v12  ;;  %v1228_v18 = vsel %vm604_vm0, %v4748_v5, 0  ;;  %v4754_v37 = vld [vmem:[%s6049_s23 + $0x61] ss:$2 sm:$0xff]  ;;  %522 = vst.msk [vmem:[#allocation2] sm:$0xff] %vm521_vm2, %v5897_v62 }
  0x30   : > { %5145 = vmatpush3.bf16.msra.mxu0 %v788_v20  ;;  %5140 = vmatprep.mubr.msk.bf16.mxu0 %vm591_vm1, %v566_v19  ;;  %v1101_v17 = vpack.c.bf16 %v4732_v15, %v4731_v14  ;;  %v4761_v19 = vld [vmem:[%s6863_s1 + $0xe] sm:$0x3]  ;;  %v4733_v20 = vld [vmem:[%s6049_s23 + $0x13a] ss:$2 sm:$0xff]  ;;  %v4774_v33 = vld [vmem:[%s6863_s1 + $0x10] sm:$0x3] }
  0x31   : > { %5756 = vmatprep.subr.msk.bf16.mxu0 %vm604_vm0, %v4709_v21  ;;  %v4734_v21 = vld [vmem:[%s6049_s23 + $0x16a] ss:$2 sm:$0xff]  ;;  %v1338_v32 = vsel %vm604_vm0, %v4761_v19, 0  ;;  %v4757_v42 = vld [vmem:[%s6049_s23 + $0xf1] ss:$2 sm:$0xff]  ;;  %526 = vst.msk [vmem:[#allocation2 + $0x90] sm:$0xff] %vm521_vm2, %v5897_v62 }
  0x32   : > { %v4740_v22 = vld [vmem:[%s6049_s23 + $0x30] ss:$2 sm:$0xff]  ;;  %v4741_v23 = vld [vmem:[%s6049_s23 + $0x60] ss:$2 sm:$0xff]  ;;  %v1102_v24 = vpack.c.bf16 %v4734_v21, %v4733_v20  ;;  %v4758_v43 = vld [vmem:[%s6049_s23 + $0x121] ss:$2 sm:$0xff] }
  0x33   : > { %v1209_v25 = vpack.c.bf16 %v4741_v23, %v4740_v22  ;;  %v4744_v28 = vld [vmem:[%s6049_s23 + $0xf0] ss:$2 sm:$0xff]  ;;  %v4745_v29 = vld [vmem:[%s6049_s23 + $0x120] ss:$2 sm:$0xff]  ;;  %v1321_v45 = vpack.c.bf16 %v4758_v43, %v4757_v42  ;;  %v4760_v48 = vld [vmem:[%s6049_s23 + $0x181] ss:$2 sm:$0xff] }
  0x34   : > { %v1211_v31 = vpack.c.bf16 %v4745_v29, %v4744_v28  ;;  %v4746_v34 = vld [vmem:[%s6049_s23 + $0x150] ss:$2 sm:$0xff]  ;;  %v4747_v35 = vld [vmem:[%s6049_s23 + $0x180] ss:$2 sm:$0xff]  ;;  %524 = vst.msk [vmem:[#allocation2 + $0x8] sm:$0x3] %vm523_vm3, %v5897_v62 }
  0x35   : > { %v4766_v49 = vld [vmem:[%s6049_s23 + $0x32] ss:$2 sm:$0xff]  ;;  %v4767_v50 = vld [vmem:[%s6049_s23 + $0x62] ss:$2 sm:$0xff]  ;;  %527 = vst.msk [vmem:[#allocation2 + $0x98] sm:$0x3] %vm523_vm3, %v5897_v62 }
  0x36   : > { %v4771_v56 = vld [vmem:[%s6049_s23 + $0x122] ss:$2 sm:$0xff]  ;;  %v4772_v59 = vld [vmem:[%s6049_s23 + $0x152] ss:$2 sm:$0xff]  ;;  %530 = vst.msk [vmem:[#allocation2 + $0x10] sm:$0x1] %vm528_vm4, %v5897_v62 }
  0x37   : > { %5141 = vmatmul.mubr.msk.bf16.gmra.mrb[4].mxu0 %vm591_vm1, %v567_v26  ;;  %v4742_v26 = vld [vmem:[%s6049_s23 + $0x90] ss:$2 sm:$0xff]  ;;  %531 = vst.msk [vmem:[#allocation2 + $0x20] sm:$0x1] %vm528_vm4, %v5897_v62  ;;  %532 = vst.msk [vmem:[#allocation2 + $0x30] sm:$0x1] %vm528_vm4, %v5897_v62 }
  0x38   : > { %5146 = vmatprep.mubr.msk.bf16.mxu0 %vm591_vm1, %v769_v27  ;;  %v4743_v27 = vld [vmem:[%s6049_s23 + $0xc0] ss:$2 sm:$0xff]  ;;  %533 = vst.msk [vmem:[#allocation2 + $0x40] sm:$0x1] %vm528_vm4, %v5897_v62  ;;  %534 = vst.msk [vmem:[#allocation2 + $0x50] sm:$0x1] %vm528_vm4, %v5897_v62 }
  0x39   : > { %v1210_v30 = vpack.c.bf16 %v4743_v27, %v4742_v26  ;;  %535 = vst.msk [vmem:[#allocation2 + $0x60] sm:$0x1] %vm528_vm4, %v5897_v62  ;;  %536 = vst.msk [vmem:[#allocation2 + $0x70] sm:$0x1] %vm528_vm4, %v5897_v62  ;;  %v4781_v63 = vld [vmem:[%s6842_s4 + $0x4] sm:$0xf] }
  0x3a   : > { %537 = vst.msk [vmem:[#allocation2 + $0x80] sm:$0x1] %vm528_vm4, %v5897_v62  ;;  %540 = vst.msk [vmem:[#allocation2 + $0x19] sm:$0x1] %vm528_vm4, %v5897_v62  ;;  %5762 = vmatprep.subr.msk.bf16.mxu1 %vm1609_vm5, %v4781_v63  ;;  %v1611_v0 = vsel %vm1609_vm5, %v4781_v63, 0  ;;  %s514_s18 = scalar_lea.vmem [#allocation3], %s4662_s29 }
  0x3b   : > { %541 = vst.msk [vmem:[#allocation2 + $0x29] sm:$0x1] %vm528_vm4, %v5897_v62  ;;  %542 = vst.msk [vmem:[#allocation2 + $0x39] sm:$0x1] %vm528_vm4, %v5897_v62  ;;  %5215 = vmatpush3.bf16.msra.mxu1 %v1611_v0  ;;  %v1582_v1 = vld [vmem:[%s6842_s4] sm:$0xf] }
  0x3c   : > { %543 = vst.msk [vmem:[#allocation2 + $0x49] sm:$0x1] %vm528_vm4, %v5897_v62  ;;  %544 = vst.msk [vmem:[#allocation2 + $0x59] sm:$0x1] %vm528_vm4, %v5897_v62  ;;  %5763 = vmatprep.subr.msk.bf16.mxu1 %vm1609_vm5, %v1582_v1  ;;  %v4779_v6 = vld [vmem:[%s6865_s2] ss:$0 sm:$0xff] }
  0x3d   : > { %545 = vst.msk [vmem:[#allocation2 + $0x69] sm:$0x1] %vm528_vm4, %v5897_v62  ;;  %546 = vst.msk [vmem:[#allocation2 + $0x79] sm:$0x1] %vm528_vm4, %v5897_v62  ;;  %v2515_v7 = vld [vmem:[%s6845_s7] sm:$0x3] }
  0x3e   : > { %547 = vst.msk [vmem:[#allocation2 + $0x89] sm:$0x1] %vm528_vm4, %v5897_v62  ;;  %529 = vst.msk [vmem:[#allocation2] sm:$0x1] %vm528_vm4, %v5897_v62  ;;  %v4780_v9 = vld [vmem:[%s6841_s3] ss:$0 sm:$0xff] }
  0x3f   : > { %5147 = vmatmul.mubr.msk.bf16.vlgmr.msra.gmra.mrb[0].mxu0 %vm591_vm1, %v770_v38  ;;  %v1212_v38 = vpack.c.bf16 %v4747_v35, %v4746_v34  ;;  %538 = vst.msk [vmem:[#allocation2 + $0x90] sm:$0x1] %vm528_vm4, %v5897_v62  ;;  %539 = vst.msk [vmem:[#allocation2 + $0x9] sm:$0x1] %vm528_vm4, %v5897_v62  ;;  %s4550_s30 = sshll.u32 %s514_s18, 4  ;;  %s5898_s29 = smov [#allocation3]   ;;  %s6789_s30 = int_to_ptr.vmem [resolvable:$true] %s4550_s30 }
  0x40   : > { %5155 = vmatpush3.bf16.msra.mxu0 %v898_v40  ;;  %5150 = vmatprep.mubr.msk.bf16.mxu0 %vm591_vm1, %v771_v39  ;;  %v1319_v39 = vpack.c.bf16 %v4754_v37, %v4753_v36  ;;  %v4755_v40 = vld [vmem:[%s6049_s23 + $0x91] ss:$2 sm:$0xff]  ;;  %548 = vst.msk [vmem:[#allocation2 + $0x99] sm:$0x1] %vm528_vm4, %v5897_v62  ;;  %s5833_s28 = scalar_lea.vmem %s6789_s30, 1024 }
  0x41   : > { %5757 = vmatprep.subr.msk.bf16.mxu0 %vm604_vm0, %v4722_v41  ;;  %v4756_v41 = vld [vmem:[%s6049_s23 + $0xc1] ss:$2 sm:$0xff]  ;;  %p5834_p11 = scmp.ne.s32.totalorder %s6789_s30, %s5833_s28 }
  0x42   : > { %v1320_v44 = vpack.c.bf16 %v4756_v41, %v4755_v40 }
  0x43   : > { %p5835_p12 = pnand %p5834_p11, %p6024_p5 }
  0x45   : > { %p5836_p13 = pneg %p5835_p12 }
  0x47   : > { %5151 = vmatmul.mubr.msk.bf16.gmra.mrb[4].mxu0 %vm591_vm1, %v772_v46  ;;  %v1448_v46 = vsel %vm604_vm0, %v4774_v33, 0 }
  0x48   : > { %5156 = vmatprep.mubr.msk.bf16.mxu0 %vm591_vm1, %v879_v47  ;;  %v4759_v47 = vld [vmem:[%s6049_s23 + $0x151] ss:$2 sm:$0xff] }
  0x49   : > { %v1322_v51 = vpack.c.bf16 %v4760_v48, %v4759_v47 }
  0x4f   : > { %5157 = vmatmul.mubr.msk.bf16.vlgmr.msra.gmra.mrb[0].mxu0 %vm591_vm1, %v880_v52  ;;  %v1429_v52 = vpack.c.bf16 %v4767_v50, %v4766_v49 }
  0x50   : > { %5165 = vmatpush3.bf16.msra.mxu0 %v1008_v54  ;;  %5160 = vmatprep.mubr.msk.bf16.mxu0 %vm591_vm1, %v881_v53  ;;  %v4768_v53 = vld [vmem:[%s6049_s23 + $0x92] ss:$2 sm:$0xff]  ;;  %v4769_v54 = vld [vmem:[%s6049_s23 + $0xc2] ss:$2 sm:$0xff] }
  0x51   : > { %5758 = vmatprep.subr.msk.bf16.mxu0 %vm604_vm0, %v4735_v55  ;;  %v4770_v55 = vld [vmem:[%s6049_s23 + $0xf2] ss:$2 sm:$0xff]  ;;  %v1430_v57 = vpack.c.bf16 %v4769_v54, %v4768_v53  ;;  %v4827_v53 = vld [vmem:[%s6049_s23 + $0x19] ss:$2 sm:$0xff]  ;;  %v4828_v54 = vld [vmem:[%s6049_s23 + $0x49] ss:$2 sm:$0xff] }
  0x52   : > { %v1431_v58 = vpack.c.bf16 %v4771_v56, %v4770_v55  ;;  %v4790_v55 = vld [vmem:[%s6842_s4 + $0x8] sm:$0xf]  ;;  %v4829_v56 = vld [vmem:[%s6049_s23 + $0x79] ss:$2 sm:$0xff] }
  0x57   : > { %5161 = vmatmul.mubr.msk.bf16.gmra.mrb[4].mxu0 %vm591_vm1, %v882_v60  ;;  %v4773_v60 = vld [vmem:[%s6049_s23 + $0x182] ss:$2 sm:$0xff] }
  0x58   : > { %5166 = vmatprep.mubr.msk.bf16.mxu0 %vm591_vm1, %v989_v61  ;;  %v1432_v61 = vpack.c.bf16 %v4773_v60, %v4772_v59  ;;  %v4831_v60 = vld [vmem:[%s6049_s23 + $0xd9] ss:$2 sm:$0xff] }
  0x5f   : > { %5167 = vmatmul.mubr.msk.bf16.vlgmr.msra.gmra.mrb[0].mxu0 %vm591_vm1, %v990_v2 }
  0x60   : > { %5175 = vmatpush3.bf16.msra.mxu0 %v1118_v4  ;;  %5170 = vmatprep.mubr.msk.bf16.mxu0 %vm591_vm1, %v991_v3 }
  0x61   : > { %5759 = vmatprep.subr.msk.bf16.mxu0 %vm604_vm0, %v4748_v5 }
  0x67   : > { %5171 = vmatmul.mubr.msk.bf16.gmra.mrb[4].mxu0 %vm591_vm1, %v992_v10 }
  0x68   : > { %5176 = vmatprep.mubr.msk.bf16.mxu0 %vm591_vm1, %v1099_v11 }
  0x6f   : > { %5177 = vmatmul.mubr.msk.bf16.vlgmr.msra.gmra.mrb[0].mxu0 %vm591_vm1, %v1100_v16 }
  0x70   : > { %5185 = vmatpush3.bf16.msra.mxu0 %v1228_v18  ;;  %5180 = vmatprep.mubr.msk.bf16.mxu0 %vm591_vm1, %v1101_v17 }
  0x71   : > { %5760 = vmatprep.subr.msk.bf16.mxu0 %vm604_vm0, %v4761_v19 }
  0x77   : > { %5181 = vmatmul.mubr.msk.bf16.gmra.mrb[4].mxu0 %vm591_vm1, %v1102_v24  ;;  %v2529_v24 = vsel %vm604_vm0, %v2515_v7, 0 }
  0x78   : > { %5186 = vmatprep.mubr.msk.bf16.mxu0 %vm591_vm1, %v1209_v25 }
  0x7f   : > { %5187 = vmatmul.mubr.msk.bf16.vlgmr.msra.gmra.mrb[0].mxu0 %vm591_vm1, %v1210_v30 }
  0x80   : > { %5195 = vmatpush3.bf16.msra.mxu0 %v1338_v32  ;;  %5190 = vmatprep.mubr.msk.bf16.mxu0 %vm591_vm1, %v1211_v31 }
  0x81   : > { %5761 = vmatprep.subr.msk.bf16.mxu0 %vm604_vm0, %v4774_v33 }
  0x87   : > { %5191 = vmatmul.mubr.msk.bf16.gmra.mrb[4].mxu0 %vm591_vm1, %v1212_v38  ;;  %v6241_v38 = vld [vmem:[#allocation2 + $0x1] sm:$0xff] }
  0x88   : > { %5196 = vmatprep.mubr.msk.bf16.mxu0 %vm591_vm1, %v1319_v39 }
  0x8f   : > { %5197 = vmatmul.mubr.msk.bf16.vlgmr.msra.gmra.mrb[0].mxu0 %vm591_vm1, %v1320_v44 }
  0x90   : > { %5205 = vmatpush3.bf16.msra.mxu0 %v1448_v46  ;;  %5200 = vmatprep.mubr.msk.bf16.mxu0 %vm591_vm1, %v1321_v45 }
  0x91   : > { %5771 = vmatprep.subr.msk.bf16.mxu0 %vm604_vm0, %v2515_v7 }
  0x97   : > { %5201 = vmatmul.mubr.msk.bf16.gmra.mrb[4].mxu0 %vm591_vm1, %v1322_v51 }
  0x98   : > { %5206 = vmatprep.mubr.msk.bf16.mxu0 %vm591_vm1, %v1429_v52  ;;  %v1691_v52 = vsel %vm1609_vm5, %v1582_v1, 0 }
  0x9f   : > { %5207 = vmatmul.mubr.msk.bf16.vlgmr.msra.gmra.mrb[0].mxu0 %vm591_vm1, %v1430_v57  ;;  %v4830_v57 = vld [vmem:[%s6049_s23 + $0xa9] ss:$2 sm:$0xff] }
  0xa0   : > { %5210 = vmatprep.mubr.msk.bf16.mxu0 %vm591_vm1, %v1431_v58  ;;  %5305 = vmatpush3.bf16.msra.mxu0 %v2529_v24  ;;  %v2511_v58 = vpack.c.bf16 %v4828_v54, %v4827_v53  ;;  %v2512_v59 = vpack.c.bf16 %v4830_v57, %v4829_v56  ;;  %v4815_v56 = vld [vmem:[%s6842_s4 + $0x1c] sm:$0xf] }
  0xa7   : > { %5211 = vmatmul.mubr.msk.bf16.gmra.mrb[4].mxu0 %vm591_vm1, %v1432_v61  ;;  %v4832_v61 = vld [vmem:[%s6049_s23 + $0x109] ss:$2 sm:$0xff] }
  0xa8   : > { %5306 = vmatprep.mubr.msk.bf16.mxu0 %vm591_vm1, %v2511_v58  ;;  %v2513_v62 = vpack.c.bf16 %v4832_v61, %v4831_v60  ;;  %v4820_v60 = vld [vmem:[%s6842_s4 + $0x20] sm:$0xf]  ;;  %v6383_v61 = vld [vmem:[#allocation2 + $0x90] sm:$0xff] }
  0xaf   : > { %5307 = vmatmul.mubr.msk.bf16.vlgmr.msra.gmra.mrb[8].mxu0 %vm591_vm1, %v2512_v59  ;;  %v2296_v59 = vsel %vm1609_vm5, %v4815_v56, 0 }
  0xb0   : > { %5310 = vmatprep.mubr.msk.bf16.mxu0 %vm591_vm1, %v2513_v62 }
  0xfa   : > { %v5132_v2 = vpop.f32.mrb[0].mxu1 }
  0xfb   : > { %v658_v3 = vpop.f32.mrb[1].mxu1 }
  0xfc   : > { %v5133_v4 = vpop.f32.mrb[2].mxu1 }
  0xfd   : > { %v661_v5 = vpop.f32.mrb[3].mxu1 }
 0x172   : > { %v5208_v8 = vpop.f32.mrb[0].mxu0 }
 0x173   : > { %v1532_v10 = vmul.f32 %v5208_v8, %v4779_v6  ;;  %v1484_v11 = vpop.f32.mrb[1].mxu0  ;;  %v4834_v8 = vld [vmem:[%s6049_s23 + $0x169] ss:$2 sm:$0xff] }
 0x174   : > { %v1530_v12 = vmul.f32 %v4779_v6, %v1484_v11  ;;  %v5209_v13 = vpop.f32.mrb[2].mxu0 }
 0x175   : > { %v1547_v14 = vadd.f32 %v4780_v9, %v1532_v10  ;;  %v1533_v15 = vmul.f32 %v5209_v13, %v4779_v6  ;;  %v1487_v16 = vpop.f32.mrb[3].mxu0 }
 0x176   : > { %v1545_v17 = vadd.f32 %v4780_v9, %v1530_v12  ;;  %v1531_v18 = vmul.f32 %v4779_v6, %v1487_v16 }
 0x177   : > { %v1555_v19 = vmax.f32 %v1547_v14, 0.0  ;;  %v1548_v20 = vadd.f32 %v4780_v9, %v1533_v15  ;;  %v1785_v15 = vsel %vm1609_vm5, %v4790_v55, 0 }
 0x178   : > { %v1553_v21 = vmax.f32 %v1545_v17, 0.0  ;;  %v1546_v22 = vadd.f32 %v4780_v9, %v1531_v18  ;;  %v4795_v18 = vld [vmem:[%s6842_s4 + $0xc] sm:$0xf] }
 0x179   : > { %1564 = vst.msk [vmem:[#allocation2 + $0x31] sm:$0xff] %vm521_vm2, %v1555_v19  ;;  %v1556_v23 = vmax.f32 %v1548_v20, 0.0  ;;  %v6316_v20 = vld [vmem:[#allocation2 + $0x2] sm:$0xff] }
 0x17a   : > { %1562 = vst.msk [vmem:[#allocation2 + $0x11] sm:$0xff] %vm521_vm2, %v1553_v21  ;;  %v1554_v25 = vmax.f32 %v1546_v22, 0.0  ;;  %v5212_v26 = vpop.f32.mrb[4].mxu0 }
 0x17b   : > { %1565 = vst.msk [vmem:[#allocation2 + $0x41] sm:$0xff] %vm521_vm2, %v1556_v23  ;;  %v5496_v27 = vadd.f32 %v5212_v26, %v5132_v2  ;;  %v1500_v28 = vpop.f32.mrb[5].mxu0  ;;  %v6283_v2 = vld [vmem:[#allocation2] sm:$0xff] }
 0x17c   : > { %1563 = vst.msk [vmem:[#allocation2 + $0x21] sm:$0xff] %vm521_vm2, %v1554_v25  ;;  %v5497_v29 = vadd.f32 %v1500_v28, %v658_v3  ;;  %v5213_v30 = vpop.f32.mrb[6].mxu0 }
 0x17d   : > { %v1536_v31 = vmul.f32 %v5496_v27, %v4779_v6  ;;  %v5498_v32 = vadd.f32 %v5213_v30, %v5133_v4  ;;  %v1503_v33 = vpop.f32.mrb[7].mxu0  ;;  %v4833_v4 = vld [vmem:[%s6049_s23 + $0x139] ss:$2 sm:$0xff]  ;;  %s6787_s23 = scalar_lea.hbm %s6854_s16, %s4938_s19  ;;  %s5837_s19 = sshll.u32 %s5898_s29, 4  ;;  %s5838_s19 = int_to_ptr.vmem [resolvable:$false] %s5837_s19 }
 0x17e   : > { %v1534_v34 = vmul.f32 %v5497_v29, %v4779_v6  ;;  %v5499_v35 = vadd.f32 %v1503_v33, %v661_v5  ;;  %v2514_v10 = vpack.c.bf16 %v4834_v8, %v4833_v4  ;;  %v1887_v29 = vsel %vm1609_vm5, %v4795_v18, 0  ;;  %s5839_s1 = scalar_lea.vmem %s5838_s19, 2048  ;;  %p5840_p0 = scmp.lt.s32.totalorder %s6789_s30, %s5838_s19 }
 0x17f   : > { %v1551_v36 = vadd.f32 %v4780_v9, %v1536_v31  ;;  %v1537_v37 = vmul.f32 %v5498_v32, %v4779_v6  ;;  %v4800_v32 = vld [vmem:[%s6842_s4 + $0x10] sm:$0xf]  ;;  %p5841_p1 = scmp.lt.s32.totalorder %s5839_s1, %s5833_s28 }
 0x180   : > { %v1549_v39 = vadd.f32 %v4780_v9, %v1534_v34  ;;  %v1535_v40 = vmul.f32 %v5499_v35, %v4779_v6  ;;  %v6250_v49 = vld [vmem:[#allocation2 + $0x31] sm:$0xff]  ;;  %5311 = vmatmul.mubr.msk.bf16.gmra.mrb[12].mxu0 %vm591_vm1, %v2514_v10 }
 0x181   : > { %v1559_v41 = vmax.f32 %v1551_v36, 0.0  ;;  %v1552_v42 = vadd.f32 %v4780_v9, %v1537_v37  ;;  %v6243_v43 = vld [vmem:[#allocation2 + $0x11] sm:$0xff]  ;;  %p5842_p2 = por %p5841_p1, %p5840_p0 }
 0x182   : > { %v1557_v44 = vmax.f32 %v1549_v39, 0.0  ;;  %v1550_v45 = vadd.f32 %v4780_v9, %v1535_v40  ;;  %v1591_v46 = vpack.c.bf16 %v6243_v43, %v6241_v38  ;;  %v6275_v63 = vld [vmem:[#allocation2 + $0x41] sm:$0xff]  ;;  %v1571_v3 = vld [vmem:[#allocation2 + $0x10] sm:$0xff]  ;;  %v1989_v39 = vsel %vm1609_vm5, %v4800_v32, 0  ;;  %v5308_v4 = vpop.f32.mrb[8].mxu0 }
 0x183   : > { %1568 = vst.msk [vmem:[#allocation2 + $0x71] sm:$0xff] %vm521_vm2, %v1559_v41  ;;  %v1560_v47 = vmax.f32 %v1552_v42, 0.0  ;;  %v6248_v48 = vld [vmem:[#allocation2 + $0x21] sm:$0xff]  ;;  %v1578_v9 = vpack.c.bf16 %v1571_v3, %v6283_v2  ;;  %v1573_v13 = vld [vmem:[#allocation2 + $0x30] sm:$0xff]  ;;  %p5843_p3 = pnand %p5842_p2, %p5836_p13 }
 0x184   : > { %1566 = vst.msk [vmem:[#allocation2 + $0x51] sm:$0xff] %vm521_vm2, %v1557_v44  ;;  %v1558_v50 = vmax.f32 %v1550_v45, 0.0  ;;  %5216 = vmatprep.mubr.msk.bf16.mxu1 %vm521_vm2, %v1591_v46  ;;  %v6256_v51 = vpack.c.bf16 %v6250_v49, %v6248_v48  ;;  %v1572_v11 = vld [vmem:[#allocation2 + $0x20] sm:$0xff]  ;;  %v1759_v21 = vld [vmem:[#allocation2 + $0x12] sm:$0xff]  ;;  %v1970_v45 = vpack.c.bf16 %v6248_v48, %v6243_v43  ;;  %v1971_v46 = vpack.c.bf16 %v6275_v63, %v6250_v49 }
 0x185   : > { %1569 = vst.msk [vmem:[#allocation2 + $0x81] sm:$0xff] %vm521_vm2, %v1560_v47  ;;  %v6303_v14 = vpack.c.bf16 %v1573_v13, %v1572_v11  ;;  %v1574_v16 = vld [vmem:[#allocation2 + $0x40] sm:$0xff]  ;;  %v1766_v24 = vpack.c.bf16 %v1759_v21, %v6316_v20  ;;  %v1761_v27 = vld [vmem:[#allocation2 + $0x32] sm:$0xff]  ;;  %v1868_v36 = vpack.c.bf16 %v1572_v11, %v1571_v3 }
 0x186   : > { %1567 = vst.msk [vmem:[#allocation2 + $0x61] sm:$0xff] %vm521_vm2, %v1558_v50  ;;  %5217 = vmatmul.mubr.msk.bf16.vlgmr.msra.gmra.mrb[4].mxu1 %vm521_vm2, %v6256_v51  ;;  %v1760_v25 = vld [vmem:[#allocation2 + $0x22] sm:$0xff]  ;;  %v1869_v37 = vpack.c.bf16 %v1574_v16, %v1573_v13  ;;  %v4805_v41 = vld [vmem:[%s6842_s4 + $0x14] sm:$0xf] }
 0x187   : > { %5225 = vmatpush3.bf16.msra.mxu1 %v1691_v52  ;;  %v6324_v28 = vpack.c.bf16 %v1761_v27, %v1760_v25  ;;  %v1762_v30 = vld [vmem:[#allocation2 + $0x42] sm:$0xff]  ;;  %v2091_v47 = vsel %vm1609_vm5, %v4805_v41, 0  ;;  %v4810_v52 = vld [vmem:[%s6842_s4 + $0x18] sm:$0xf]  ;;  %v2072_v49 = vpack.c.bf16 %v1760_v25, %v1759_v21 }
 0x188   : > { %5764 = vmatprep.subr.msk.bf16.mxu1 %vm1609_vm5, %v4790_v55  ;;  %v2073_v53 = vpack.c.bf16 %v1762_v30, %v1761_v27  ;;  %v2194_v54 = vsel %vm1609_vm5, %v4810_v52, 0 }
 0x18a   : > { %v6289_v6 = vld [vmem:[#allocation2 + $0x71] sm:$0xff] }
 0x18b   : > { %v6277_v0 = vld [vmem:[#allocation2 + $0x51] sm:$0xff] }
 0x18c   : > { %v6281_v1 = vpack.c.bf16 %v6277_v0, %v6275_v63  ;;  %v1575_v12 = vld [vmem:[#allocation2 + $0x50] sm:$0xff]  ;;  %v1867_v42 = vld [vmem:[#allocation2 + $0x80] sm:$0xff]  ;;  %v2398_v63 = vsel %vm1609_vm5, %v4820_v60, 0 }
 0x18d   : > { %v6287_v5 = vld [vmem:[#allocation2 + $0x61] sm:$0xff]  ;;  %v6306_v17 = vpack.c.bf16 %v1575_v12, %v1574_v16  ;;  %v1577_v22 = vld [vmem:[#allocation2 + $0x70] sm:$0xff]  ;;  %v2178_v62 = vpack.c.bf16 %v6383_v61, %v1867_v42 }
 0x18e   : > { %5220 = vmatprep.mubr.msk.bf16.mxu1 %vm521_vm2, %v6281_v1  ;;  %v6295_v7 = vpack.c.bf16 %v6289_v6, %v6287_v5  ;;  %v1576_v19 = vld [vmem:[#allocation2 + $0x60] sm:$0xff]  ;;  %v1763_v26 = vld [vmem:[#allocation2 + $0x52] sm:$0xff]  ;;  %v1871_v44 = vpack.c.bf16 %v1867_v42, %v1577_v22  ;;  %v1972_v50 = vpack.c.bf16 %v6287_v5, %v6277_v0  ;;  %v2565_v5 = vpop.f32.mrb[9].mxu0 }
 0x18f   : > { %v6318_v23 = vpack.c.bf16 %v1577_v22, %v1576_v19  ;;  %v6327_v31 = vpack.c.bf16 %v1763_v26, %v1762_v30  ;;  %v1764_v33 = vld [vmem:[#allocation2 + $0x62] sm:$0xff]  ;;  %v1765_v34 = vld [vmem:[#allocation2 + $0x72] sm:$0xff]  ;;  %v1870_v40 = vpack.c.bf16 %v1576_v19, %v1575_v12  ;;  %v4825_v19 = vld [vmem:[%s6843_s5] ss:$0 sm:$0xff] }
 0x190   : > { %5221 = vmatmul.mubr.msk.bf16.gmra.mrb[8].mxu1 %vm521_vm2, %v6295_v7  ;;  %v1769_v35 = vpack.c.bf16 %v1765_v34, %v1764_v33  ;;  %v1969_v43 = vld [vmem:[#allocation2 + $0x81] sm:$0xff]  ;;  %v2074_v55 = vpack.c.bf16 %v1764_v33, %v1763_v26  ;;  %v6394_v0 = vld [vmem:[#allocation2 + $0x91] sm:$0xff]  ;;  %v4826_v22 = vld [vmem:[%s6844_s6] ss:$0 sm:$0xff] }
 0x191   : > { %5226 = vmatprep.mubr.msk.bf16.mxu1 %vm521_vm2, %v1578_v9  ;;  %v1973_v48 = vpack.c.bf16 %v1969_v43, %v6289_v6  ;;  %v2071_v57 = vld [vmem:[#allocation2 + $0x82] sm:$0xff]  ;;  %v2280_v3 = vpack.c.bf16 %v6394_v0, %v1969_v43  ;;  %v5309_v6 = vpop.f32.mrb[10].mxu0 }
 0x192   : > { %v2075_v58 = vpack.c.bf16 %v2071_v57, %v1765_v34  ;;  %v4841_v9 = vld [vmem:[%s6848_s10 + $0x4] sm:$0xf] }
 0x193   : > { %v2682_v11 = vsel %vm1609_vm5, %v4841_v9, 0 }
 0x198   : > { %5227 = vmatmul.mubr.msk.bf16.vlgmr.msra.gmra.mrb[4].mxu1 %vm521_vm2, %v6303_v14 }
 0x199   : > { %5235 = vmatpush3.bf16.msra.mxu1 %v1785_v15  ;;  %5230 = vmatprep.mubr.msk.bf16.mxu1 %vm521_vm2, %v6306_v17  ;;  %v4839_v15 = vld [vmem:[%s6846_s8] ss:$0 sm:$0xff] }
 0x19a   : > { %5765 = vmatprep.subr.msk.bf16.mxu1 %vm1609_vm5, %v4795_v18  ;;  %v2605_v16 = vmul.f32 %v5308_v4, %v4839_v15  ;;  %v2603_v18 = vmul.f32 %v4839_v15, %v2565_v5 }
 0x1a0   : > { %5231 = vmatmul.mubr.msk.bf16.gmra.mrb[8].mxu1 %vm521_vm2, %v6318_v23 }
 0x1a1   : > { %5236 = vmatprep.mubr.msk.bf16.mxu1 %vm521_vm2, %v1766_v24  ;;  %v2606_v24 = vmul.f32 %v5309_v6, %v4839_v15 }
 0x1a8   : > { %5237 = vmatmul.mubr.msk.bf16.vlgmr.msra.gmra.mrb[4].mxu1 %vm521_vm2, %v6324_v28 }
 0x1a9   : > { %5245 = vmatpush3.bf16.msra.mxu1 %v1887_v29  ;;  %5240 = vmatprep.mubr.msk.bf16.mxu1 %vm521_vm2, %v6327_v31 }
 0x1aa   : > { %5766 = vmatprep.subr.msk.bf16.mxu1 %vm1609_vm5, %v4800_v32 }
 0x1b0   : > { %5241 = vmatmul.mubr.msk.bf16.gmra.mrb[8].mxu1 %vm521_vm2, %v1769_v35 }
 0x1b1   : > { %5246 = vmatprep.mubr.msk.bf16.mxu1 %vm521_vm2, %v1868_v36 }
 0x1b8   : > { %5247 = vmatmul.mubr.msk.bf16.vlgmr.msra.gmra.mrb[4].mxu1 %vm521_vm2, %v1869_v37 }
 0x1b9   : > { %5255 = vmatpush3.bf16.msra.mxu1 %v1989_v39  ;;  %5250 = vmatprep.mubr.msk.bf16.mxu1 %vm521_vm2, %v1870_v40 }
 0x1ba   : > { %5767 = vmatprep.subr.msk.bf16.mxu1 %vm1609_vm5, %v4805_v41 }
 0x1c0   : > { %5251 = vmatmul.mubr.msk.bf16.gmra.mrb[8].mxu1 %vm521_vm2, %v1871_v44 }
 0x1c1   : > { %5256 = vmatprep.mubr.msk.bf16.mxu1 %vm521_vm2, %v1970_v45 }
 0x1c8   : > { %5257 = vmatmul.mubr.msk.bf16.vlgmr.msra.gmra.mrb[4].mxu1 %vm521_vm2, %v1971_v46 }
 0x1c9   : > { %5265 = vmatpush3.bf16.msra.mxu1 %v2091_v47  ;;  %5260 = vmatprep.mubr.msk.bf16.mxu1 %vm521_vm2, %v1972_v50 }
 0x1ca   : > { %5768 = vmatprep.subr.msk.bf16.mxu1 %vm1609_vm5, %v4810_v52 }
 0x1d0   : > { %5261 = vmatmul.mubr.msk.bf16.gmra.mrb[8].mxu1 %vm521_vm2, %v1973_v48 }
 0x1d1   : > { %5266 = vmatprep.mubr.msk.bf16.mxu1 %vm521_vm2, %v2072_v49 }
 0x1d8   : > { %5267 = vmatmul.mubr.msk.bf16.vlgmr.msra.gmra.mrb[4].mxu1 %vm521_vm2, %v2073_v53 }
 0x1d9   : > { %5275 = vmatpush3.bf16.msra.mxu1 %v2194_v54  ;;  %5270 = vmatprep.mubr.msk.bf16.mxu1 %vm521_vm2, %v2074_v55 }
 0x1da   : > { %5769 = vmatprep.subr.msk.bf16.mxu1 %vm1609_vm5, %v4815_v56 }
 0x1e0   : > { %5271 = vmatmul.mubr.msk.bf16.gmra.mrb[8].mxu1 %vm521_vm2, %v2075_v58 }
 0x1e1   : > { %5276 = vmatprep.mubr.msk.bf16.mxu1 %vm521_vm2, %v6303_v14  ;;  %v6415_v14 = vld [vmem:[%s6848_s10] sm:$0xf] }
 0x1e8   : > { %5277 = vmatmul.mubr.msk.bf16.vlgmr.msra.gmra.mrb[4].mxu1 %vm521_vm2, %v6306_v17  ;;  %v4840_v17 = vld [vmem:[%s6847_s9] ss:$0 sm:$0xff] }
 0x1e9   : > { %5285 = vmatpush3.bf16.msra.mxu1 %v2296_v59  ;;  %5280 = vmatprep.mubr.msk.bf16.mxu1 %vm521_vm2, %v6318_v23  ;;  %v2620_v23 = vadd.f32 %v4840_v17, %v2605_v16  ;;  %v2618_v27 = vadd.f32 %v4840_v17, %v2603_v18  ;;  %v2621_v36 = vadd.f32 %v4840_v17, %v2606_v24 }
 0x1ea   : > { %5770 = vmatprep.subr.msk.bf16.mxu1 %vm1609_vm5, %v4820_v60 }
 0x1f0   : > { %5281 = vmatmul.mubr.msk.bf16.gmra.mrb[8].mxu1 %vm521_vm2, %v2178_v62 }
 0x1f1   : > { %5286 = vmatprep.mubr.msk.bf16.mxu1 %vm521_vm2, %v6256_v51  ;;  %v6403_v51 = vld [vmem:[#allocation2 + $0x92] sm:$0xff] }
 0x1f8   : > { %5287 = vmatmul.mubr.msk.bf16.vlgmr.msra.gmra.mrb[4].mxu1 %vm521_vm2, %v6281_v1  ;;  %v2382_v1 = vpack.c.bf16 %v6403_v51, %v2071_v57 }
 0x1f9   : > { %5295 = vmatpush3.bf16.msra.mxu1 %v2398_v63  ;;  %5290 = vmatprep.mubr.msk.bf16.mxu1 %vm521_vm2, %v6295_v7  ;;  %v2568_v7 = vpop.f32.mrb[11].mxu0 }
 0x1fa   : > { %5772 = vmatprep.subr.msk.bf16.mxu1 %vm1609_vm5, %v4841_v9 }
 0x200   : > { %5291 = vmatmul.mubr.msk.bf16.gmra.mrb[8].mxu1 %vm521_vm2, %v2280_v3 }
 0x201   : > { %5296 = vmatprep.mubr.msk.bf16.mxu1 %vm521_vm2, %v6324_v28  ;;  %v2604_v28 = vmul.f32 %v4839_v15, %v2568_v7 }
 0x203   : > { %v2619_v41 = vadd.f32 %v4840_v17, %v2604_v28 }
 0x208   : > { %5297 = vmatmul.mubr.msk.bf16.vlgmr.msra.gmra.mrb[4].mxu1 %vm521_vm2, %v6327_v31 }
 0x209   : > { %5300 = vmatprep.mubr.msk.bf16.mxu1 %vm521_vm2, %v1769_v35  ;;  %5315 = vmatpush3.bf16.msra.mxu1 %v2682_v11 }
 0x20a   : > { %5773 = vmatprep.subr.msk.bf16.mxu1 %vm1609_vm5, %v6415_v14 }
 0x210   : > { %5301 = vmatmul.mubr.msk.bf16.gmra.mrb[8].mxu1 %vm521_vm2, %v2382_v1 }
 0x253   : > { %v5312_v8 = vpop.f32.mrb[12].mxu0 }
 0x254   : > { %v2581_v10 = vpop.f32.mrb[13].mxu0  ;;  %v2609_v40 = vmul.f32 %v5312_v8, %v4839_v15 }
 0x255   : > { %v5313_v12 = vpop.f32.mrb[14].mxu0  ;;  %v2607_v45 = vmul.f32 %v4839_v15, %v2581_v10 }
 0x256   : > { %v2584_v13 = vpop.f32.mrb[15].mxu0  ;;  %v2624_v52 = vadd.f32 %v4840_v17, %v2609_v40  ;;  %v2610_v43 = vmul.f32 %v5313_v12, %v4839_v15 }
 0x257   : > { %v2622_v53 = vadd.f32 %v4840_v17, %v2607_v45  ;;  %v2608_v54 = vmul.f32 %v4839_v15, %v2584_v13  ;;  %v2762_v15 = vsel %vm1609_vm5, %v6415_v14, 0 }
 0x258   : > { %v2625_v63 = vadd.f32 %v4840_v17, %v2610_v43  ;;  %v4860_v43 = vld [vmem:[%s6848_s10 + $0x10] sm:$0xf] }
 0x259   : > { %v2623_v4 = vadd.f32 %v4840_v17, %v2608_v54 }
 0x2db   : > { %v5298_v21 = vpop.f32.mrb[4].mxu1 }
 0x2dc   : > { %v2482_v25 = vmul.f32 %v5298_v21, %v4825_v19  ;;  %v2434_v26 = vpop.f32.mrb[5].mxu1 }
 0x2dd   : > { %v2480_v29 = vmul.f32 %v4825_v19, %v2434_v26  ;;  %v5299_v30 = vpop.f32.mrb[6].mxu1 }
 0x2de   : > { %v2497_v31 = vadd.f32 %v4826_v22, %v2482_v25  ;;  %v2483_v32 = vmul.f32 %v5299_v30, %v4825_v19  ;;  %v2437_v33 = vpop.f32.mrb[7].mxu1 }
 0x2df   : > { %v2495_v34 = vadd.f32 %v4826_v22, %v2480_v29  ;;  %v2481_v35 = vmul.f32 %v4825_v19, %v2437_v33 }
 0x2e0   : > { %v6431_v37 = vadd.f32 %v2620_v23, %v2497_v31  ;;  %v2498_v39 = vadd.f32 %v4826_v22, %v2483_v32  ;;  %v4855_v31 = vld [vmem:[%s6848_s10 + $0xc] sm:$0xf] }
 0x2e1   : > { %v6433_v42 = vadd.f32 %v2618_v27, %v2495_v34  ;;  %v2496_v44 = vadd.f32 %v4826_v22, %v2481_v35  ;;  %v2958_v45 = vsel %vm1609_vm5, %v4855_v31, 0 }
 0x2e2   : > { %2636 = vst.msk [vmem:[#allocation2 + $0x31] sm:$0xff] %vm521_vm2, %v6431_v37  ;;  %v6437_v46 = vadd.f32 %v2621_v36, %v2498_v39 }
 0x2e3   : > { %2634 = vst.msk [vmem:[#allocation2 + $0x11] sm:$0xff] %vm521_vm2, %v6433_v42  ;;  %v6441_v47 = vadd.f32 %v2619_v41, %v2496_v44  ;;  %v5302_v50 = vpop.f32.mrb[8].mxu1 }
 0x2e4   : > { %2637 = vst.msk [vmem:[#allocation2 + $0x41] sm:$0xff] %vm521_vm2, %v6437_v46  ;;  %v2486_v48 = vmul.f32 %v5302_v50, %v4825_v19  ;;  %v2450_v49 = vpop.f32.mrb[9].mxu1 }
 0x2e5   : > { %2635 = vst.msk [vmem:[#allocation2 + $0x21] sm:$0xff] %vm521_vm2, %v6441_v47  ;;  %v2484_v55 = vmul.f32 %v4825_v19, %v2450_v49  ;;  %v5303_v56 = vpop.f32.mrb[10].mxu1 }
 0x2e6   : > { %v2501_v57 = vadd.f32 %v4826_v22, %v2486_v48  ;;  %v2487_v58 = vmul.f32 %v5303_v56, %v4825_v19  ;;  %v2453_v59 = vpop.f32.mrb[11].mxu1  ;;  %v3060_v56 = vsel %vm1609_vm5, %v4860_v43, 0 }
 0x2e7   : > { %v2499_v60 = vadd.f32 %v4826_v22, %v2484_v55  ;;  %v2485_v62 = vmul.f32 %v4825_v19, %v2453_v59 }
 0x2e8   : > { %v6447_v3 = vadd.f32 %v2624_v52, %v2501_v57  ;;  %v2502_v1 = vadd.f32 %v4826_v22, %v2487_v58  ;;  %v4865_v58 = vld [vmem:[%s6848_s10 + $0x14] sm:$0xf] }
 0x2e9   : > { %v6449_v5 = vadd.f32 %v2622_v53, %v2499_v60  ;;  %v2500_v6 = vadd.f32 %v4826_v22, %v2485_v62  ;;  %v6467_v12 = vld [vmem:[#allocation2 + $0x31] sm:$0xff] }
 0x2ea   : > { %2640 = vst.msk [vmem:[#allocation2 + $0x71] sm:$0xff] %vm521_vm2, %v6447_v3  ;;  %v6453_v7 = vadd.f32 %v2625_v63, %v2502_v1  ;;  %v6455_v8 = vld [vmem:[#allocation2 + $0x11] sm:$0xff]  ;;  %v3162_v1 = vsel %vm1609_vm5, %v4865_v58, 0 }
 0x2eb   : > { %2638 = vst.msk [vmem:[#allocation2 + $0x51] sm:$0xff] %vm521_vm2, %v6449_v5  ;;  %v6459_v9 = vadd.f32 %v2623_v4, %v2500_v6  ;;  %v2663_v10 = vpack.c.bf16 %v6455_v8, %v6241_v38  ;;  %v4850_v38 = vld [vmem:[%s6848_s10 + $0x8] sm:$0xf]  ;;  %v2643_v19 = vld [vmem:[#allocation2 + $0x10] sm:$0xff]  ;;  %v2646_v29 = vld [vmem:[#allocation2 + $0x40] sm:$0xff] }
 0x2ec   : > { %2641 = vst.msk [vmem:[#allocation2 + $0x81] sm:$0xff] %vm521_vm2, %v6453_v7  ;;  %v6465_v11 = vld [vmem:[#allocation2 + $0x21] sm:$0xff]  ;;  %v2650_v23 = vpack.c.bf16 %v2643_v19, %v6283_v2  ;;  %v2645_v26 = vld [vmem:[#allocation2 + $0x30] sm:$0xff]  ;;  %v2856_v28 = vsel %vm1609_vm5, %v4850_v38, 0  ;;  %v4870_v6 = vld [vmem:[%s6848_s10 + $0x18] sm:$0xf] }
 0x2ed   : > { %2639 = vst.msk [vmem:[#allocation2 + $0x61] sm:$0xff] %vm521_vm2, %v6459_v9  ;;  %5316 = vmatprep.mubr.msk.bf16.mxu1 %vm521_vm2, %v2663_v10  ;;  %v6474_v13 = vpack.c.bf16 %v6467_v12, %v6465_v11  ;;  %v6484_v16 = vld [vmem:[#allocation2 + $0x41] sm:$0xff]  ;;  %v2830_v33 = vld [vmem:[#allocation2 + $0x12] sm:$0xff]  ;;  %v2940_v55 = vpack.c.bf16 %v2646_v29, %v2645_v26  ;;  %v3041_v62 = vpack.c.bf16 %v6465_v11, %v6455_v8 }
 0x2ee   : > { %v2644_v24 = vld [vmem:[#allocation2 + $0x20] sm:$0xff]  ;;  %v2837_v36 = vpack.c.bf16 %v2830_v33, %v6316_v20  ;;  %v2832_v41 = vld [vmem:[#allocation2 + $0x32] sm:$0xff]  ;;  %v3042_v63 = vpack.c.bf16 %v6484_v16, %v6467_v12 }
 0x2ef   : > { %5317 = vmatmul.mubr.msk.bf16.vlgmr.msra.gmra.mrb[12].mxu1 %vm521_vm2, %v6474_v13  ;;  %v6506_v27 = vpack.c.bf16 %v2645_v26, %v2644_v24  ;;  %v2831_v39 = vld [vmem:[#allocation2 + $0x22] sm:$0xff]  ;;  %v2939_v54 = vpack.c.bf16 %v2644_v24, %v2643_v19 }
 0x2f0   : > { %5325 = vmatpush3.bf16.msra.mxu1 %v2762_v15  ;;  %v6525_v44 = vpack.c.bf16 %v2832_v41, %v2831_v39  ;;  %v2833_v50 = vld [vmem:[#allocation2 + $0x42] sm:$0xff]  ;;  %v3143_v11 = vpack.c.bf16 %v2831_v39, %v2830_v33  ;;  %v3264_v15 = vsel %vm1609_vm5, %v4870_v6, 0 }
 0x2f1   : > { %5774 = vmatprep.subr.msk.bf16.mxu1 %vm1609_vm5, %v4850_v38  ;;  %v6494_v21 = vld [vmem:[#allocation2 + $0x71] sm:$0xff]  ;;  %v3144_v12 = vpack.c.bf16 %v2833_v50, %v2832_v41  ;;  %v3601_v26 = vld [vmem:[%s6851_s13] sm:$0xf] }
 0x2f2   : > { %v6486_v17 = vld [vmem:[#allocation2 + $0x51] sm:$0xff] }
 0x2f3   : > { %v6490_v18 = vpack.c.bf16 %v6486_v17, %v6484_v16  ;;  %v2647_v25 = vld [vmem:[#allocation2 + $0x50] sm:$0xff]  ;;  %v2938_v59 = vld [vmem:[#allocation2 + $0x80] sm:$0xff]  ;;  %v4875_v16 = vld [vmem:[%s6848_s10 + $0x1c] sm:$0xf] }
 0x2f4   : > { %v6492_v14 = vld [vmem:[#allocation2 + $0x61] sm:$0xff]  ;;  %v6509_v30 = vpack.c.bf16 %v2647_v25, %v2646_v29  ;;  %v2649_v34 = vld [vmem:[#allocation2 + $0x70] sm:$0xff]  ;;  %v4886_v29 = vld [vmem:[%s6850_s12] ss:$0 sm:$0xff] }
 0x2f5   : > { %5320 = vmatprep.mubr.msk.bf16.mxu1 %vm521_vm2, %v6490_v18  ;;  %v6500_v22 = vpack.c.bf16 %v6494_v21, %v6492_v14  ;;  %v2648_v32 = vld [vmem:[#allocation2 + $0x60] sm:$0xff]  ;;  %v2834_v40 = vld [vmem:[#allocation2 + $0x52] sm:$0xff]  ;;  %v2942_v60 = vpack.c.bf16 %v2938_v59, %v2649_v34  ;;  %v3043_v4 = vpack.c.bf16 %v6492_v14, %v6486_v17  ;;  %v3366_v14 = vsel %vm1609_vm5, %v4875_v16, 0 }
 0x2f6   : > { %v6519_v35 = vpack.c.bf16 %v2649_v34, %v2648_v32  ;;  %v6528_v52 = vpack.c.bf16 %v2834_v40, %v2833_v50  ;;  %v2835_v48 = vld [vmem:[#allocation2 + $0x62] sm:$0xff]  ;;  %v2836_v49 = vld [vmem:[#allocation2 + $0x72] sm:$0xff]  ;;  %v2941_v57 = vpack.c.bf16 %v2648_v32, %v2647_v25 }
 0x2f7   : > { %5321 = vmatmul.mubr.msk.bf16.gmra.mrb[16].mxu1 %vm521_vm2, %v6500_v22  ;;  %v2840_v53 = vpack.c.bf16 %v2836_v49, %v2835_v48  ;;  %v3040_v8 = vld [vmem:[#allocation2 + $0x81] sm:$0xff]  ;;  %v3145_v38 = vpack.c.bf16 %v2835_v48, %v2834_v40 }
 0x2f8   : > { %5326 = vmatprep.mubr.msk.bf16.mxu1 %vm521_vm2, %v2650_v23  ;;  %v3044_v10 = vpack.c.bf16 %v3040_v8, %v6494_v21  ;;  %v3142_v17 = vld [vmem:[#allocation2 + $0x82] sm:$0xff]  ;;  %v3248_v23 = vpack.c.bf16 %v6383_v61, %v2938_v59  ;;  %v3350_v25 = vpack.c.bf16 %v6394_v0, %v3040_v8 }
 0x2f9   : > { %v3146_v19 = vpack.c.bf16 %v3142_v17, %v2836_v49  ;;  %v4880_v21 = vld [vmem:[%s6848_s10 + $0x20] sm:$0xf] }
 0x2fa   : > { %v3468_v24 = vsel %vm1609_vm5, %v4880_v21, 0 }
 0x2ff   : > { %5327 = vmatmul.mubr.msk.bf16.vlgmr.msra.gmra.mrb[12].mxu1 %vm521_vm2, %v6506_v27 }
 0x300   : > { %5335 = vmatpush3.bf16.msra.mxu1 %v2856_v28  ;;  %5330 = vmatprep.mubr.msk.bf16.mxu1 %vm521_vm2, %v6509_v30 }
 0x301   : > { %5775 = vmatprep.subr.msk.bf16.mxu1 %vm1609_vm5, %v4855_v31 }
 0x307   : > { %5331 = vmatmul.mubr.msk.bf16.gmra.mrb[16].mxu1 %vm521_vm2, %v6519_v35 }
 0x308   : > { %5336 = vmatprep.mubr.msk.bf16.mxu1 %vm521_vm2, %v2837_v36 }
 0x30f   : > { %5337 = vmatmul.mubr.msk.bf16.vlgmr.msra.gmra.mrb[12].mxu1 %vm521_vm2, %v6525_v44 }
 0x310   : > { %5345 = vmatpush3.bf16.msra.mxu1 %v2958_v45  ;;  %5340 = vmatprep.mubr.msk.bf16.mxu1 %vm521_vm2, %v6528_v52 }
 0x311   : > { %5776 = vmatprep.subr.msk.bf16.mxu1 %vm1609_vm5, %v4860_v43 }
 0x317   : > { %5341 = vmatmul.mubr.msk.bf16.gmra.mrb[16].mxu1 %vm521_vm2, %v2840_v53 }
 0x318   : > { %5346 = vmatprep.mubr.msk.bf16.mxu1 %vm521_vm2, %v2939_v54 }
 0x31f   : > { %5347 = vmatmul.mubr.msk.bf16.vlgmr.msra.gmra.mrb[12].mxu1 %vm521_vm2, %v2940_v55 }
 0x320   : > { %5355 = vmatpush3.bf16.msra.mxu1 %v3060_v56  ;;  %5350 = vmatprep.mubr.msk.bf16.mxu1 %vm521_vm2, %v2941_v57 }
 0x321   : > { %5777 = vmatprep.subr.msk.bf16.mxu1 %vm1609_vm5, %v4865_v58 }
 0x327   : > { %5351 = vmatmul.mubr.msk.bf16.gmra.mrb[16].mxu1 %vm521_vm2, %v2942_v60 }
 0x328   : > { %5356 = vmatprep.mubr.msk.bf16.mxu1 %vm521_vm2, %v3041_v62 }
 0x32f   : > { %5357 = vmatmul.mubr.msk.bf16.vlgmr.msra.gmra.mrb[12].mxu1 %vm521_vm2, %v3042_v63 }
 0x330   : > { %5365 = vmatpush3.bf16.msra.mxu1 %v3162_v1  ;;  %5360 = vmatprep.mubr.msk.bf16.mxu1 %vm521_vm2, %v3043_v4  ;;  %v3602_v1 = vld [vmem:[#allocation2 + $0x1] sm:$0xff] }
 0x331   : > { %5778 = vmatprep.subr.msk.bf16.mxu1 %vm1609_vm5, %v4870_v6 }
 0x337   : > { %5361 = vmatmul.mubr.msk.bf16.gmra.mrb[16].mxu1 %vm521_vm2, %v3044_v10 }
 0x338   : > { %5366 = vmatprep.mubr.msk.bf16.mxu1 %vm521_vm2, %v3143_v11 }
 0x33f   : > { %5367 = vmatmul.mubr.msk.bf16.vlgmr.msra.gmra.mrb[12].mxu1 %vm521_vm2, %v3144_v12 }
 0x340   : > { %5375 = vmatpush3.bf16.msra.mxu1 %v3264_v15  ;;  %5370 = vmatprep.mubr.msk.bf16.mxu1 %vm521_vm2, %v3145_v38 }
 0x341   : > { %5779 = vmatprep.subr.msk.bf16.mxu1 %vm1609_vm5, %v4875_v16 }
 0x347   : > { %5371 = vmatmul.mubr.msk.bf16.gmra.mrb[16].mxu1 %vm521_vm2, %v3146_v19  ;;  %v4896_v19 = vld [vmem:[%s6851_s13 + $0x8] sm:$0xf] }
 0x348   : > { %5376 = vmatprep.mubr.msk.bf16.mxu1 %vm521_vm2, %v6506_v27  ;;  %v4885_v27 = vld [vmem:[%s6849_s11] ss:$0 sm:$0xff] }
 0x34f   : > { %5377 = vmatmul.mubr.msk.bf16.vlgmr.msra.gmra.mrb[12].mxu1 %vm521_vm2, %v6509_v30 }
 0x350   : > { %5385 = vmatpush3.bf16.msra.mxu1 %v3366_v14  ;;  %5380 = vmatprep.mubr.msk.bf16.mxu1 %vm521_vm2, %v6519_v35 }
 0x351   : > { %5780 = vmatprep.subr.msk.bf16.mxu1 %vm1609_vm5, %v4880_v21 }
 0x357   : > { %5381 = vmatmul.mubr.msk.bf16.gmra.mrb[16].mxu1 %vm521_vm2, %v3248_v23 }
 0x358   : > { %5386 = vmatprep.mubr.msk.bf16.mxu1 %vm521_vm2, %v6474_v13  ;;  %v3452_v13 = vpack.c.bf16 %v6403_v51, %v3142_v17  ;;  %v3709_v17 = vsel %vm1609_vm5, %v3601_v26, 0 }
 0x35f   : > { %5387 = vmatmul.mubr.msk.bf16.vlgmr.msra.gmra.mrb[12].mxu1 %vm521_vm2, %v6490_v18  ;;  %v4887_v18 = vld [vmem:[%s6851_s13 + $0x4] sm:$0xf] }
 0x360   : > { %5395 = vmatpush3.bf16.msra.mxu1 %v3468_v24  ;;  %5390 = vmatprep.mubr.msk.bf16.mxu1 %vm521_vm2, %v6500_v22  ;;  %v3629_v22 = vsel %vm1609_vm5, %v4887_v18, 0 }
 0x361   : > { %5781 = vmatprep.subr.msk.bf16.mxu0 %vm1609_vm5, %v4887_v18 }
 0x362   : > { %5405 = vmatpush3.bf16.msra.mxu0 %v3629_v22 }
 0x363   : > { %5782 = vmatprep.subr.msk.bf16.mxu0 %vm1609_vm5, %v3601_v26 }
 0x367   : > { %5391 = vmatmul.mubr.msk.bf16.gmra.mrb[16].mxu1 %vm521_vm2, %v3350_v25 }
 0x368   : > { %5396 = vmatprep.mubr.msk.bf16.mxu1 %vm521_vm2, %v6525_v44 }
 0x36f   : > { %5397 = vmatmul.mubr.msk.bf16.vlgmr.msra.gmra.mrb[12].mxu1 %vm521_vm2, %v6528_v52 }
 0x370   : > { %5400 = vmatprep.mubr.msk.bf16.mxu1 %vm521_vm2, %v2840_v53 }
 0x377   : > { %5401 = vmatmul.mubr.msk.bf16.gmra.mrb[16].mxu1 %vm521_vm2, %v3452_v13 }
 0x442   : > { %v5398_v28 = vpop.f32.mrb[12].mxu1 }
 0x443   : > { %v3552_v30 = vmul.f32 %v5398_v28, %v4885_v27  ;;  %v3504_v31 = vpop.f32.mrb[13].mxu1 }
 0x444   : > { %v3550_v32 = vmul.f32 %v4885_v27, %v3504_v31  ;;  %v5399_v33 = vpop.f32.mrb[14].mxu1 }
 0x445   : > { %v3567_v34 = vadd.f32 %v4886_v29, %v3552_v30  ;;  %v3553_v35 = vmul.f32 %v5399_v33, %v4885_v27  ;;  %v3507_v36 = vpop.f32.mrb[15].mxu1  ;;  %v3803_v30 = vsel %vm1609_vm5, %v4896_v19, 0  ;;  %v4901_v33 = vld [vmem:[%s6851_s13 + $0xc] sm:$0xf] }
 0x446   : > { %v3565_v39 = vadd.f32 %v4886_v29, %v3550_v32  ;;  %v3551_v40 = vmul.f32 %v4885_v27, %v3507_v36 }
 0x447   : > { %v3575_v41 = vmax.f32 %v3567_v34, 0.0  ;;  %v3568_v44 = vadd.f32 %v4886_v29, %v3553_v35 }
 0x448   : > { %v3573_v45 = vmax.f32 %v3565_v39, 0.0  ;;  %v3566_v50 = vadd.f32 %v4886_v29, %v3551_v40 }
 0x449   : > { %3583 = vst.msk [vmem:[#allocation2 + $0x31] sm:$0xff] %vm521_vm2, %v3575_v41  ;;  %v3576_v52 = vmax.f32 %v3568_v44, 0.0 }
 0x44a   : > { %3581 = vst.msk [vmem:[#allocation2 + $0x11] sm:$0xff] %vm521_vm2, %v3573_v45  ;;  %v3574_v43 = vmax.f32 %v3566_v50, 0.0  ;;  %v5402_v48 = vpop.f32.mrb[16].mxu1  ;;  %v3905_v50 = vsel %vm1609_vm5, %v4901_v33, 0 }
 0x44b   : > { %3584 = vst.msk [vmem:[#allocation2 + $0x41] sm:$0xff] %vm521_vm2, %v3576_v52  ;;  %v3556_v49 = vmul.f32 %v5402_v48, %v4885_v27  ;;  %v3520_v53 = vpop.f32.mrb[17].mxu1  ;;  %v4906_v48 = vld [vmem:[%s6851_s13 + $0x10] sm:$0xf] }
 0x44c   : > { %3582 = vst.msk [vmem:[#allocation2 + $0x21] sm:$0xff] %vm521_vm2, %v3574_v43  ;;  %v3554_v54 = vmul.f32 %v4885_v27, %v3520_v53  ;;  %v5403_v55 = vpop.f32.mrb[18].mxu1 }
 0x44d   : > { %v3571_v56 = vadd.f32 %v4886_v29, %v3556_v49  ;;  %v3557_v57 = vmul.f32 %v5403_v55, %v4885_v27  ;;  %v3523_v58 = vpop.f32.mrb[19].mxu1 }
 0x44e   : > { %v3569_v59 = vadd.f32 %v4886_v29, %v3554_v54  ;;  %v3555_v60 = vmul.f32 %v4885_v27, %v3523_v58  ;;  %v4911_v58 = vld [vmem:[%s6851_s13 + $0x14] sm:$0xf] }
 0x44f   : > { %v3579_v62 = vmax.f32 %v3571_v56, 0.0  ;;  %v3572_v63 = vadd.f32 %v4886_v29, %v3557_v57  ;;  %v4007_v56 = vsel %vm1609_vm5, %v4906_v48, 0 }
 0x450   : > { %v3577_v4 = vmax.f32 %v3569_v59, 0.0  ;;  %v3570_v6 = vadd.f32 %v4886_v29, %v3555_v60  ;;  %v6629_v38 = vld [vmem:[#allocation2 + $0x31] sm:$0xff] }
 0x451   : > { %3587 = vst.msk [vmem:[#allocation2 + $0x71] sm:$0xff] %vm521_vm2, %v3579_v62  ;;  %v3580_v8 = vmax.f32 %v3572_v63, 0.0  ;;  %v6622_v10 = vld [vmem:[#allocation2 + $0x11] sm:$0xff] }
 0x452   : > { %3585 = vst.msk [vmem:[#allocation2 + $0x51] sm:$0xff] %vm521_vm2, %v3577_v4  ;;  %v3578_v11 = vmax.f32 %v3570_v6, 0.0  ;;  %v3610_v12 = vpack.c.bf16 %v6622_v10, %v3602_v1  ;;  %v6644_v14 = vld [vmem:[#allocation2 + $0x41] sm:$0xff]  ;;  %v3590_v24 = vld [vmem:[#allocation2 + $0x10] sm:$0xff]  ;;  %v4109_v1 = vsel %vm1609_vm5, %v4911_v58, 0 }
 0x453   : > { %3588 = vst.msk [vmem:[#allocation2 + $0x81] sm:$0xff] %vm521_vm2, %v3580_v8  ;;  %v6627_v15 = vld [vmem:[#allocation2 + $0x21] sm:$0xff]  ;;  %v3597_v22 = vpack.c.bf16 %v3590_v24, %v6283_v2  ;;  %v3592_v28 = vld [vmem:[#allocation2 + $0x30] sm:$0xff]  ;;  %v3989_v63 = vpack.c.bf16 %v6644_v14, %v6629_v38  ;;  %v4916_v6 = vld [vmem:[%s6851_s13 + $0x18] sm:$0xf] }
 0x454   : > { %3586 = vst.msk [vmem:[#allocation2 + $0x61] sm:$0xff] %vm521_vm2, %v3578_v11  ;;  %5406 = vmatprep.mubr.msk.bf16.mxu0 %vm521_vm2, %v3610_v12  ;;  %v6635_v16 = vpack.c.bf16 %v6629_v38, %v6627_v15  ;;  %v3591_v26 = vld [vmem:[#allocation2 + $0x20] sm:$0xff]  ;;  %v3777_v34 = vld [vmem:[#allocation2 + $0x12] sm:$0xff]  ;;  %v3988_v62 = vpack.c.bf16 %v6627_v15, %v6622_v10  ;;  %v4211_v15 = vsel %vm1609_vm5, %v4916_v6, 0 }
 0x455   : > { %v6666_v29 = vpack.c.bf16 %v3592_v28, %v3591_v26  ;;  %v3593_v31 = vld [vmem:[#allocation2 + $0x40] sm:$0xff]  ;;  %v3784_v39 = vpack.c.bf16 %v3777_v34, %v6316_v20  ;;  %v3779_v44 = vld [vmem:[#allocation2 + $0x32] sm:$0xff]  ;;  %v3886_v54 = vpack.c.bf16 %v3591_v26, %v3590_v24 }
 0x456   : > { %5407 = vmatmul.mubr.msk.bf16.vlgmr.msra.gmra.mrb[16].mxu0 %vm521_vm2, %v6635_v16  ;;  %v3778_v40 = vld [vmem:[#allocation2 + $0x22] sm:$0xff]  ;;  %v3887_v55 = vpack.c.bf16 %v3593_v31, %v3592_v28 }
 0x457   : > { %5415 = vmatpush3.bf16.msra.mxu0 %v3709_v17  ;;  %v6685_v45 = vpack.c.bf16 %v3779_v44, %v3778_v40  ;;  %v3780_v52 = vld [vmem:[#allocation2 + $0x42] sm:$0xff]  ;;  %v4090_v11 = vpack.c.bf16 %v3778_v40, %v3777_v34  ;;  %v4921_v17 = vld [vmem:[%s6851_s13 + $0x1c] sm:$0xf] }
 0x458   : > { %5783 = vmatprep.subr.msk.bf16.mxu0 %vm1609_vm5, %v4896_v19  ;;  %v6654_v13 = vld [vmem:[#allocation2 + $0x71] sm:$0xff]  ;;  %v4091_v12 = vpack.c.bf16 %v3780_v52, %v3779_v44  ;;  %v4926_v24 = vld [vmem:[%s6851_s13 + $0x20] sm:$0xf] }
 0x459   : > { %v6646_v21 = vld [vmem:[#allocation2 + $0x51] sm:$0xff] }
 0x45a   : > { %v6650_v23 = vpack.c.bf16 %v6646_v21, %v6644_v14  ;;  %v3594_v27 = vld [vmem:[#allocation2 + $0x50] sm:$0xff]  ;;  %v3885_v59 = vld [vmem:[#allocation2 + $0x80] sm:$0xff] }
 0x45b   : > { %v6652_v25 = vld [vmem:[#allocation2 + $0x61] sm:$0xff]  ;;  %v6669_v32 = vpack.c.bf16 %v3594_v27, %v3593_v31  ;;  %v3596_v35 = vld [vmem:[#allocation2 + $0x70] sm:$0xff] }
 0x45c   : > { %5410 = vmatprep.mubr.msk.bf16.mxu0 %vm521_vm2, %v6650_v23  ;;  %v6660_v18 = vpack.c.bf16 %v6654_v13, %v6652_v25  ;;  %v3595_v2 = vld [vmem:[#allocation2 + $0x60] sm:$0xff]  ;;  %v3781_v41 = vld [vmem:[#allocation2 + $0x52] sm:$0xff]  ;;  %v3889_v60 = vpack.c.bf16 %v3885_v59, %v3596_v35  ;;  %v3990_v4 = vpack.c.bf16 %v6652_v25, %v6646_v21  ;;  %v4313_v21 = vsel %vm1609_vm5, %v4921_v17, 0 }
 0x45d   : > { %v6679_v36 = vpack.c.bf16 %v3596_v35, %v3595_v2  ;;  %v6688_v43 = vpack.c.bf16 %v3781_v41, %v3780_v52  ;;  %v3782_v20 = vld [vmem:[#allocation2 + $0x62] sm:$0xff]  ;;  %v3783_v49 = vld [vmem:[#allocation2 + $0x72] sm:$0xff]  ;;  %v3888_v57 = vpack.c.bf16 %v3595_v2, %v3594_v27  ;;  %v4195_v25 = vpack.c.bf16 %v6383_v61, %v3885_v59 }
 0x45e   : > { %5411 = vmatmul.mubr.msk.bf16.gmra.mrb[20].mxu0 %vm521_vm2, %v6660_v18  ;;  %v3787_v53 = vpack.c.bf16 %v3783_v49, %v3782_v20  ;;  %v3987_v8 = vld [vmem:[#allocation2 + $0x81] sm:$0xff]  ;;  %v4092_v38 = vpack.c.bf16 %v3782_v20, %v3781_v41 }
 0x45f   : > { %5416 = vmatprep.mubr.msk.bf16.mxu0 %vm521_vm2, %v3597_v22  ;;  %v3991_v10 = vpack.c.bf16 %v3987_v8, %v6654_v13  ;;  %v4089_v19 = vld [vmem:[#allocation2 + $0x82] sm:$0xff]  ;;  %v4415_v13 = vsel %vm1609_vm5, %v4926_v24, 0  ;;  %v4297_v22 = vpack.c.bf16 %v6394_v0, %v3987_v8 }
 0x460   : > { %v4093_v14 = vpack.c.bf16 %v4089_v19, %v3783_v49  ;;  %v4399_v61 = vpack.c.bf16 %v6403_v51, %v4089_v19 }
 0x466   : > { %5417 = vmatmul.mubr.msk.bf16.vlgmr.msra.gmra.mrb[16].mxu0 %vm521_vm2, %v6666_v29 }
 0x467   : > { %5425 = vmatpush3.bf16.msra.mxu0 %v3803_v30  ;;  %5420 = vmatprep.mubr.msk.bf16.mxu0 %vm521_vm2, %v6669_v32 }
 0x468   : > { %5784 = vmatprep.subr.msk.bf16.mxu0 %vm1609_vm5, %v4901_v33 }
 0x46e   : > { %5421 = vmatmul.mubr.msk.bf16.gmra.mrb[20].mxu0 %vm521_vm2, %v6679_v36 }
 0x46f   : > { %5426 = vmatprep.mubr.msk.bf16.mxu0 %vm521_vm2, %v3784_v39 }
 0x476   : > { %5427 = vmatmul.mubr.msk.bf16.vlgmr.msra.gmra.mrb[16].mxu0 %vm521_vm2, %v6685_v45 }
 0x477   : > { %5435 = vmatpush3.bf16.msra.mxu0 %v3905_v50  ;;  %5430 = vmatprep.mubr.msk.bf16.mxu0 %vm521_vm2, %v6688_v43 }
 0x478   : > { %5785 = vmatprep.subr.msk.bf16.mxu0 %vm1609_vm5, %v4906_v48 }
 0x47e   : > { %5431 = vmatmul.mubr.msk.bf16.gmra.mrb[20].mxu0 %vm521_vm2, %v3787_v53 }
 0x47f   : > { %5436 = vmatprep.mubr.msk.bf16.mxu0 %vm521_vm2, %v3886_v54 }
 0x486   : > { %5437 = vmatmul.mubr.msk.bf16.vlgmr.msra.gmra.mrb[16].mxu0 %vm521_vm2, %v3887_v55 }
 0x487   : > { %5445 = vmatpush3.bf16.msra.mxu0 %v4007_v56  ;;  %5440 = vmatprep.mubr.msk.bf16.mxu0 %vm521_vm2, %v3888_v57 }
 0x488   : > { %5786 = vmatprep.subr.msk.bf16.mxu0 %vm1609_vm5, %v4911_v58 }
 0x48e   : > { %5441 = vmatmul.mubr.msk.bf16.gmra.mrb[20].mxu0 %vm521_vm2, %v3889_v60 }
 0x48f   : > { %5446 = vmatprep.mubr.msk.bf16.mxu0 %vm521_vm2, %v3988_v62 }
 0x496   : > { %5447 = vmatmul.mubr.msk.bf16.vlgmr.msra.gmra.mrb[16].mxu0 %vm521_vm2, %v3989_v63 }
 0x497   : > { %5455 = vmatpush3.bf16.msra.mxu0 %v4109_v1  ;;  %5450 = vmatprep.mubr.msk.bf16.mxu0 %vm521_vm2, %v3990_v4 }
 0x498   : > { %5787 = vmatprep.subr.msk.bf16.mxu0 %vm1609_vm5, %v4916_v6 }
 0x49e   : > { %5451 = vmatmul.mubr.msk.bf16.gmra.mrb[20].mxu0 %vm521_vm2, %v3991_v10 }
 0x49f   : > { %5456 = vmatprep.mubr.msk.bf16.mxu0 %vm521_vm2, %v4090_v11 }
 0x4a6   : > { %5457 = vmatmul.mubr.msk.bf16.vlgmr.msra.gmra.mrb[16].mxu0 %vm521_vm2, %v4091_v12 }
 0x4a7   : > { %5465 = vmatpush3.bf16.msra.mxu0 %v4211_v15  ;;  %5460 = vmatprep.mubr.msk.bf16.mxu0 %vm521_vm2, %v4092_v38 }
 0x4a8   : > { %5788 = vmatprep.subr.msk.bf16.mxu0 %vm1609_vm5, %v4921_v17 }
 0x4ae   : > { %5461 = vmatmul.mubr.msk.bf16.gmra.mrb[20].mxu0 %vm521_vm2, %v4093_v14 }
 0x4af   : > { %5466 = vmatprep.mubr.msk.bf16.mxu0 %vm521_vm2, %v6666_v29 }
 0x4b6   : > { %5467 = vmatmul.mubr.msk.bf16.vlgmr.msra.gmra.mrb[16].mxu0 %vm521_vm2, %v6669_v32 }
 0x4b7   : > { %5475 = vmatpush3.bf16.msra.mxu0 %v4313_v21  ;;  %5470 = vmatprep.mubr.msk.bf16.mxu0 %vm521_vm2, %v6679_v36 }
 0x4b8   : > { %5789 = vmatprep.subr.msk.bf16.mxu0 %vm1609_vm5, %v4926_v24 }
 0x4be   : > { %5471 = vmatmul.mubr.msk.bf16.gmra.mrb[20].mxu0 %vm521_vm2, %v4195_v25 }
 0x4bf   : > { %5476 = vmatprep.mubr.msk.bf16.mxu0 %vm521_vm2, %v6635_v16  ;;  %v4931_v16 = vld [vmem:[%s6852_s14] ss:$0 sm:$0xff] }
 0x4c6   : > { %5477 = vmatmul.mubr.msk.bf16.vlgmr.msra.gmra.mrb[16].mxu0 %vm521_vm2, %v6650_v23  ;;  %v4932_v23 = vld [vmem:[%s6853_s15] ss:$0 sm:$0xff] }
 0x4c7   : > { %5485 = vmatpush3.bf16.msra.mxu0 %v4415_v13  ;;  %5480 = vmatprep.mubr.msk.bf16.mxu0 %vm521_vm2, %v6660_v18 }
 0x4ce   : > { %5481 = vmatmul.mubr.msk.bf16.gmra.mrb[20].mxu0 %vm521_vm2, %v4297_v22 }
 0x4cf   : > { %5486 = vmatprep.mubr.msk.bf16.mxu0 %vm521_vm2, %v6685_v45 }
 0x4d6   : > { %5487 = vmatmul.mubr.msk.bf16.vlgmr.msra.gmra.mrb[16].mxu0 %vm521_vm2, %v6688_v43 }
 0x4d7   : > { %5490 = vmatprep.mubr.msk.bf16.mxu0 %vm521_vm2, %v3787_v53 }
 0x4de   : > { %5491 = vmatmul.mubr.msk.bf16.gmra.mrb[20].mxu0 %vm521_vm2, %v4399_v61 }
 0x5a9   : > { %v5488_v0 = vpop.f32.mrb[16].mxu0 }
 0x5aa   : > { %v4499_v18 = vmul.f32 %v5488_v0, %v4931_v16  ;;  %v4451_v26 = vpop.f32.mrb[17].mxu0 }
 0x5ab   : > { %v4497_v27 = vmul.f32 %v4931_v16, %v4451_v26  ;;  %v5489_v28 = vpop.f32.mrb[18].mxu0 }
 0x5ac   : > { %v4514_v29 = vadd.f32 %v4932_v23, %v4499_v18  ;;  %v4500_v51 = vmul.f32 %v5489_v28, %v4931_v16  ;;  %v4454_v30 = vpop.f32.mrb[19].mxu0 }
 0x5ad   : > { %v4512_v31 = vadd.f32 %v4932_v23, %v4497_v27  ;;  %v4498_v32 = vmul.f32 %v4931_v16, %v4454_v30 }
 0x5ae   : > { %v4522_v33 = vadd.f32 %v4514_v29, %v6431_v37  ;;  %v4515_v2 = vadd.f32 %v4932_v23, %v4500_v51 }
 0x5af   : > { %v4520_v34 = vadd.f32 %v4512_v31, %v6433_v42  ;;  %v4513_v35 = vadd.f32 %v4932_v23, %v4498_v32 }
 0x5b0   : > { %4530 = vst.msk [vmem:[%s514_s18 + $0x10] sm:$0xff] %vm521_vm2, %v4522_v33  ;;  %v4523_v36 = vadd.f32 %v4515_v2, %v6437_v46 }
 0x5b1   : > { %4528 = vst.msk [vmem:[%s514_s18] sm:$0xff] %vm521_vm2, %v4520_v34  ;;  %v4521_v39 = vadd.f32 %v4513_v35, %v6441_v47  ;;  %v5492_v40 = vpop.f32.mrb[20].mxu0 }
 0x5b2   : > { %4531 = vst.msk [vmem:[%s514_s18 + $0x18] sm:$0xff] %vm521_vm2, %v4523_v36  ;;  %v4503_v41 = vmul.f32 %v5492_v40, %v4931_v16  ;;  %v4467_v44 = vpop.f32.mrb[21].mxu0 }
 0x5b3   : > { %4529 = vst.msk [vmem:[%s514_s18 + $0x8] sm:$0xff] %vm521_vm2, %v4521_v39  ;;  %v4501_v37 = vmul.f32 %v4931_v16, %v4467_v44  ;;  %v5493_v42 = vpop.f32.mrb[22].mxu0 }
 0x5b4   : > { %v4518_v45 = vadd.f32 %v4932_v23, %v4503_v41  ;;  %v4504_v50 = vmul.f32 %v5493_v42, %v4931_v16  ;;  %v4470_v52 = vpop.f32.mrb[23].mxu0 }
 0x5b5   : > { %v4516_v43 = vadd.f32 %v4932_v23, %v4501_v37  ;;  %v4502_v48 = vmul.f32 %v4931_v16, %v4470_v52 }
 0x5b6   : > { %v4526_v46 = vadd.f32 %v4518_v45, %v6447_v3  ;;  %v4519_v47 = vadd.f32 %v4932_v23, %v4504_v50 }
 0x5b7   : > { %v4524_v20 = vadd.f32 %v4516_v43, %v6449_v5  ;;  %v4517_v49 = vadd.f32 %v4932_v23, %v4502_v48 }
 0x5b8   : > { %4534 = vst.msk [vmem:[%s514_s18 + $0x30] sm:$0xff] %vm521_vm2, %v4526_v46  ;;  %v4527_v53 = vadd.f32 %v4519_v47, %v6453_v7 }
 0x5b9   : > { %4532 = vst.msk [vmem:[%s514_s18 + $0x20] sm:$0xff] %vm521_vm2, %v4524_v20  ;;  %v4525_v3 = vadd.f32 %v4517_v49, %v6459_v9 }
 0x5ba   : > { %4535 = vst.msk [vmem:[%s514_s18 + $0x38] sm:$0xff] %vm521_vm2, %v4527_v53 }
 0x5bb   : > { %4533 = vst.msk [vmem:[%s514_s18 + $0x28] sm:$0xff] %vm521_vm2, %v4525_v3 }
 0x5bc   : > { %5846 = shalt.err (!%p5843_p3)
}
 0x5bd   : > { %s5847_s20 = scalar_lea.hbm %s6787_s23, 1024  ;;  %s5851_s29 = scalar_lea.hbm %s6854_s16, 2048 }
 0x5be   : > { %p5848_p4 = scmp.ne.s32.totalorder %s6787_s23, %s5847_s20  ;;  %p5852_p9 = scmp.lt.u32.totalorder %s6787_s23, %s6854_s16 }
 0x5bf   : > { %p5853_p10 = scmp.lt.u32.totalorder %s5851_s29, %s5847_s20  ;;  %p5855_p12 = scmp.lt.u32.totalorder %s5847_s20, %s6787_s23 }
 0x5c0   : > { %p5849_p7 = pnand %p5848_p4, %p6024_p5 }
 0x5c1   : > { %p5854_p11 = por %p5853_p10, %p5852_p9 }
 0x5c2   : > { %p5850_p8 = pneg %p5849_p7 }
 0x5c3   : > { %p5856_p13 = por %p5855_p12, %p5854_p11 }
 0x5c5   : > { %p5857_p0 = pnand %p5856_p13, %p5850_p8 }
 0x5c7   : > { %5860 = shalt.err (!%p5857_p0)
}
 0x5c8   : > { %s5899_s28 = smov 128   ;;  %s5900_s1 = smov 8  }
 0x5c9   : > { %5791 = dma.vmem_to_hbm [thread:$0]  (%p6024_p5), %s6789_s30, 1024, %s6787_s23, %s6797_s25, %s5899_s28, %s5899_s28, %s5900_s1  }
 0x5ca PF: > { %p5797_p1 = scmp.ge.s32.totalorder %s5895_s24, 2  ;;  %s4565_s2 = sand.u32 1, %s5883_s21  }
 0x5cb   : > { %s4566_s20 = scalar_lea.sflag [#allocation4], %s4565_s2 }
 0x5cc   : > { %p5794_p2 = pnand %p5797_p1, %p6028_p6 }
 0x5ce   : > { %5878 = dma.done.wait (!%p5794_p2), %s4566_s20, 1024  }
 0x5cf   : > { %5880 = vsyncadd (!%p5794_p2), %s4566_s20, 4294966272  ;;  %s6866_s18 = sld [smem:[#allocation6_spill]]  ;;  %s6867_s23 = sld [smem:[#allocation7_spill]] }
 0x5d0   : > { %p26_p3 = scmp.ge.s32.totalorder %s6011_s27, 4   ;;  %s6868_s21 = smov %s5887_s22 }
 0x5d1   : > { %s6870_s24 = smov %s6011_s27 }
 0x5d2   :  { %28 = sbr.rel (!%p26_p3) target bundleno = 7 (0x7), region = 225 }
 0x5d5   : > { %s6869_s22 = smov %s6866_s18 }
 0x5d9   :  { %4571 = vsyncpa [#allocation4], 1 }
 0x5da   :  { %4573 = vsyncpa [#allocation4 + $0x1], 1 }

</bundles_post_ra>
